<compile_context>
chip_gen: v7x
topology: tpu7x:2x2x1
jax: 0.10.0
libtpu: 0.0.40
codegen_flags: <defaults>
</compile_context>

<pallas_src>
import functools

import jax
import jax.numpy as jnp
from jax.experimental import pallas as pl
from jax.experimental.pallas import tpu as pltpu

_LN_EPS = 1e-5


# ---------------------------------------------------------------------------
# tiling / parameter-prep helpers
# ---------------------------------------------------------------------------
def _row_tile(n, target=256):
    """Largest multiple of 8 dividing n that is <= target (else n itself)."""
    if n <= target:
        return n
    t = (target // 8) * 8
    while t >= 8:
        if n % t == 0:
            return t
        t -= 8
    return n


def _lane_tile(n, target=2048):
    """Reduction (lane) tiles must be a multiple of 128 or the full extent."""
    if n <= target or n % 128 != 0:
        return n
    t = (target // 128) * 128
    while t >= 128:
        if n % t == 0:
            return t
        t -= 128
    return n


def _bdiag(w, n):
    """Block-diagonal replication of an (a, b) matrix -> (n*a, n*b)."""
    a, b = w.shape
    m = jnp.zeros((n * a, n * b), w.dtype)
    for i in range(n):
        m = m.at[i * a:(i + 1) * a, i * b:(i + 1) * b].set(w)
    return m


def _tile_row(v, n):
    """(d,) or (1, d) -> (1, n*d) lane-tiled copy."""
    return jnp.tile(v.reshape(1, -1), (1, n))


# ---------------------------------------------------------------------------
# GraphConvolution (+ fused ReLU, optional fused post-ReLU add), batch folded
# out = relu(adj @ (X @ Wbd) + rowsum(adj) * bias_t + X) [+ extra]
#   X:   (N, B*F)  lane layout [b*F + f]
#   Wbd: (B*F, B*F) block-diagonal Linear weight (pre-transposed per block)
# ---------------------------------------------------------------------------
def _gcn_kernel(xr_ref, xk_ref, adj_ref, wbd_ref, rs_ref, b_ref, o_ref, acc_ref):
    k = pl.program_id(1)

    @pl.when(k == 0)
    def _():
        acc_ref[...] = jnp.zeros_like(acc_ref)

    # Recompute h_k = X_k @ Wbd each reduction step (Wbd is tiny, stays in VMEM).
    h_k = jnp.dot(xk_ref[...], wbd_ref[...], preferred_element_type=jnp.float32)
    acc_ref[...] += jnp.dot(adj_ref[...], h_k, preferred_element_type=jnp.float32)

    @pl.when(k == pl.num_programs(1) - 1)
    def _():
        y = acc_ref[...] + rs_ref[...] * b_ref[...]      # bias via precomputed rowsum
        y = jnp.maximum(y + xr_ref[...], 0.0)            # residual + fused ReLU
        o_ref[...] = y.astype(o_ref.dtype)


def _gcn_kernel_extra(xr_ref, xk_ref, adj_ref, wbd_ref, rs_ref, b_ref, extra_ref,
                      o_ref, acc_ref):
    k = pl.program_id(1)

    @pl.when(k == 0)
    def _():
        acc_ref[...] = jnp.zeros_like(acc_ref)

    h_k = jnp.dot(xk_ref[...], wbd_ref[...], preferred_element_type=jnp.float32)
    acc_ref[...] += jnp.dot(adj_ref[...], h_k, preferred_element_type=jnp.float32)

    @pl.when(k == pl.num_programs(1) - 1)
    def _():
        y = acc_ref[...] + rs_ref[...] * b_ref[...]
        y = jnp.maximum(y + xr_ref[...], 0.0)
        o_ref[...] = (y + extra_ref[...]).astype(o_ref.dtype)   # fused pos-emb add


def graph_conv_relu(xt, adj, w_bd, bias_t, adj_rowsum, extra=None):
    """One GraphConvolution + ReLU in the batch-folded (N, B*F) layout."""
    N, bf_in = xt.shape
    bf_out = w_bd.shape[1]
    assert bf_in == bf_out, "GraphConvolution residual needs in_features == out_features"
    tm = _row_tile(N)          # node-row tile
    tk = _lane_tile(N)         # adjacency-column (reduction) tile
    assert N % tm == 0 and N % tk == 0
    grid = (N // tm, N // tk)  # NOTE: adj is read exactly once (no batch axis)

    in_specs = [
        pl.BlockSpec((tm, bf_in), lambda i, k: (i, 0)),       # residual rows
        pl.BlockSpec((tk, bf_in), lambda i, k: (k, 0)),       # rows feeding h_k
        pl.BlockSpec((tm, tk), lambda i, k: (i, k)),          # adj tile
        pl.BlockSpec((bf_in, bf_out), lambda i, k: (0, 0)),   # block-diag weight
        pl.BlockSpec((tm, 1), lambda i, k: (i, 0)),           # rowsum(adj)
        pl.BlockSpec((1, bf_out), lambda i, k: (0, 0)),       # bias (lane-tiled)
    ]
    args = [xt, xt, adj, w_bd, adj_rowsum, bias_t]
    kernel = _gcn_kernel
    if extra is not None:                                     # only the last layer
        in_specs.append(pl.BlockSpec((tm, bf_out), lambda i, k: (i, 0)))
        args.append(extra)
        kernel = _gcn_kernel_extra

    return pl.pallas_call(
        kernel,
        out_shape=jax.ShapeDtypeStruct((N, bf_out), jnp.float32),
        grid_spec=pltpu.PrefetchScalarGridSpec(
            num_scalar_prefetch=0,
            grid=grid,
            in_specs=in_specs,
            out_specs=pl.BlockSpec((tm, bf_out), lambda i, k: (i, 0)),
            scratch_shapes=[pltpu.VMEM((tm, bf_out), jnp.float32)],
        ),
        compiler_params=pltpu.CompilerParams(
            dimension_semantics=("parallel", "arbitrary")),
    )(*args)


# ---------------------------------------------------------------------------
# Fused: num_layers AttentionBlocks + mean-pool over S + LayerNorm + classifier
# Activations live as (S, B*E); each S row is independent through every
# attention layer (attention length = B lives in lanes), so the whole stack
# runs VMEM-resident per tile.  Pooling is accumulated across grid steps.
# ---------------------------------------------------------------------------
def _transformer_pool_head_kernel(
        x_ref, wqkv_ref, bqkv_ref, wo_ref, bo_ref, g2_ref, be2_ref,
        w1_ref, b1_ref, w2_ref, b2_ref, segeh_ref, seghe_ref, mmean_ref,
        gh_ref, beh_ref, wh_ref, bh_ref, o_ref, acc_ref,
        *, num_layers, attn_len, embed_dim, seq_len, eps):
    step = pl.program_id(0)
    L, E = attn_len, embed_dim

    @pl.when(step == 0)
    def _():
        acc_ref[...] = jnp.zeros_like(acc_ref)

    segeh = segeh_ref[...]          # (E, H) per-head lane-segment sum
    seghe = seghe_ref[...]          # (H, E) per-head lane broadcast
    mmean = mmean_ref[...]          # (L*E, L*E) block-diag group-mean matrix

    xb = x_ref[...].astype(jnp.float32)                           # (ts, L*E)

    for li in range(num_layers):
        wqkv = wqkv_ref[li]; bqkv = bqkv_ref[li]
        wo = wo_ref[li]; bo = bo_ref[li]
        g2 = g2_ref[li]; be2 = be2_ref[li]
        w1 = w1_ref[li]; b1 = b1_ref[li]
        w2 = w2_ref[li]; b2 = b2_ref[li]

        # Joint QKV projection for all attention positions (block-diag weight;
        # 1/sqrt(Dh) already folded into the Q columns/bias in the wrapper).
        qkv = jnp.dot(xb, wqkv, preferred_element_type=jnp.float32) + bqkv
        q = [qkv[:, l * 3 * E + 0 * E: l * 3 * E + 1 * E] for l in range(L)]
        k = [qkv[:, l * 3 * E + 1 * E: l * 3 * E + 2 * E] for l in range(L)]
        v = [qkv[:, l * 3 * E + 2 * E: l * 3 * E + 3 * E] for l in range(L)]

        outs = []
        for l in range(L):
            # All-head scores vs key m via a lane-segment matmul -> (ts, H).
            s = [jnp.dot(q[l] * k[m], segeh, preferred_element_type=jnp.float32)
                 for m in range(L)]
            m_max = s[0]
            for m in range(1, L):
                m_max = jnp.maximum(m_max, s[m])
            ex = [jnp.exp(s[m] - m_max) for m in range(L)]
            den = ex[0]
            for m in range(1, L):
                den = den + ex[m]
            inv = pl.reciprocal(den, approx=True)                 # softmax denom on EUP
            o_l = jnp.zeros_like(q[l])
            for m in range(L):
                p_e = jnp.dot(ex[m] * inv, seghe,
                              preferred_element_type=jnp.float32)  # (ts, E)
                o_l = o_l + p_e * v[m]
            outs.append(o_l)
        attn = jnp.concatenate(outs, axis=-1)                     # (ts, L*E)
        attn = jnp.dot(attn, wo, preferred_element_type=jnp.float32) + bo
        x1 = xb + attn                                            # x + attn(x)
        # LayerNorm-2 per attention position via the block-diag mean matrix.
        mu = jnp.dot(x1, mmean, preferred_element_type=jnp.float32)
        d = x1 - mu
        var = jnp.dot(d * d, mmean, preferred_element_type=jnp.float32)
        xn = d * jax.lax.rsqrt(var + eps) * g2 + be2
        # MLP: Linear -> SiLU -> Linear (dropouts are inference identities).
        hdn = jnp.dot(xn, w1, preferred_element_type=jnp.float32) + b1
        hdn = hdn * pl.reciprocal(1.0 + jnp.exp(-hdn), approx=True)   # SiLU, EUP rcp
        y = jnp.dot(hdn, w2, preferred_element_type=jnp.float32) + b2
        xb = x1 + y + xb                                          # + outer residual

    # Partial mean-pool over this tile's rows; final activations never hit HBM.
    acc_ref[...] += jnp.sum(xb, axis=0, keepdims=True)            # (1, L*E)

    @pl.when(step == pl.num_programs(0) - 1)
    def _():
        pooled = acc_ref[...] * (1.0 / float(seq_len))
        mu = jnp.dot(pooled, mmean, preferred_element_type=jnp.float32)
        d = pooled - mu
        var = jnp.dot(d * d, mmean, preferred_element_type=jnp.float32)
        xn = d * jax.lax.rsqrt(var + eps) * gh_ref[...] + beh_ref[...]
        o_ref[...] = (jnp.dot(xn, wh_ref[...], preferred_element_type=jnp.float32)
                      + bh_ref[...]).astype(o_ref.dtype)


def transformer_pool_head(xt, dev, *, batch, eps=_LN_EPS):
    S, BE = xt.shape
    E = dev["segeh"].shape[0]
    assert BE == batch * E
    num_layers = dev["tr"]["wqkv"].shape[0]
    BC = dev["head"]["w"].shape[1]                    # batch * num_classes
    ts = _row_tile(S)
    assert S % ts == 0

    kern = functools.partial(
        _transformer_pool_head_kernel, num_layers=num_layers, attn_len=batch,
        embed_dim=E, seq_len=S, eps=eps)

    tr, hd = dev["tr"], dev["head"]
    consts = (tr["wqkv"], tr["bqkv"], tr["wo"], tr["bo"], tr["g2"], tr["be2"],
              tr["w1"], tr["b1"], tr["w2"], tr["b2"],
              dev["segeh"], dev["seghe"], dev["mmean"],
              hd["g"], hd["be"], hd["w"], hd["b"])

    def _full_spec(a):
        zeros = (0,) * a.ndim
        return pl.BlockSpec(a.shape, lambda i: zeros)

    return pl.pallas_call(
        kern,
        out_shape=jax.ShapeDtypeStruct((1, BC), jnp.float32),
        grid_spec=pltpu.PrefetchScalarGridSpec(
            num_scalar_prefetch=0,
            grid=(S // ts,),
            in_specs=[pl.BlockSpec((ts, BE), lambda i: (i, 0))]
                     + [_full_spec(a) for a in consts],
            out_specs=pl.BlockSpec((1, BC), lambda i: (0, 0)),
            scratch_shapes=[pltpu.VMEM((1, BE), jnp.float32)],
        ),
        # S axis carries the pooled-sum accumulator -> must be "arbitrary".
        compiler_params=pltpu.CompilerParams(dimension_semantics=("arbitrary",)),
    )(xt, *consts)


# ---------------------------------------------------------------------------
# Parameter prep (runs once, outside jit): block-diagonal weights, lane-tiled
# row vectors, folded attention scale, segment / group-mean matrices.
# ---------------------------------------------------------------------------
def prepare_params(params, *, batch, num_heads):
    E = params["gcn"][-1][0].shape[1]
    Dh = E // num_heads
    scale = 1.0 / float(Dh) ** 0.5

    dev = {"gcn": []}
    for w_t, b in params["gcn"]:
        dev["gcn"].append((_bdiag(w_t, batch), _tile_row(b, batch)))
    dev["pos_t"] = jnp.tile(params["pos"], (1, batch))            # (S, B*E)

    stacks = {k: [] for k in ("wqkv", "bqkv", "wo", "bo", "g2", "be2",
                              "w1", "b1", "w2", "b2")}
    for p in params["blocks"]:
        wqkv = p["wqkv"].at[:, :E].multiply(scale)                # fold q-scale
        bqkv = p["bqkv"].at[:, :E].multiply(scale)
        stacks["wqkv"].append(_bdiag(wqkv, batch))
        stacks["bqkv"].append(_tile_row(bqkv, batch))
        stacks["wo"].append(_bdiag(p["wo"], batch))
        stacks["bo"].append(_tile_row(p["bo"], batch))
        stacks["g2"].append(_tile_row(p["g2"], batch))
        stacks["be2"].append(_tile_row(p["be2"], batch))
        stacks["w1"].append(_bdiag(p["w1"], batch))
        stacks["b1"].append(_tile_row(p["b1"], batch))
        stacks["w2"].append(_bdiag(p["w2"], batch))
        stacks["b2"].append(_tile_row(p["b2"], batch))
    dev["tr"] = {k: jnp.stack(v) for k, v in stacks.items()}

    lane = jnp.arange(E)
    segeh = (lane[:, None] // Dh == jnp.arange(num_heads)[None, :]).astype(jnp.float32)
    dev["segeh"] = segeh                                          # (E, H)
    dev["seghe"] = segeh.T                                        # (H, E)
    dev["mmean"] = _bdiag(jnp.full((E, E), 1.0 / E, jnp.float32), batch)

    hd = params["head"]
    dev["head"] = {"g": _tile_row(hd["g"], batch), "be": _tile_row(hd["be"], batch),
                   "w": _bdiag(hd["w"], batch), "b": _tile_row(hd["b"], batch)}
    return dev


# ---------------------------------------------------------------------------
# Full forward
# ---------------------------------------------------------------------------
def asl_interpreter_forward(x, adj, dev):
    """Inference forward of ASLInterpreter.  x: (B, S, 4), adj: (S, S)."""
    B, S, f_in = x.shape
    # Fold batch into lanes once: xt[n, b*F + f] = x[b, n, f].  All kernels
    # below consume/produce this layout, so no activation transposes remain.
    xt = jnp.transpose(x, (1, 0, 2)).reshape(S, B * f_in)
    adj_rowsum = jnp.sum(adj, axis=-1, keepdims=True)             # (S, 1), once
    n_gcn = len(dev["gcn"])
    for li, (w_bd, bias_t) in enumerate(dev["gcn"]):
        extra = dev["pos_t"] if li == n_gcn - 1 else None         # fused pos-emb add
        xt = graph_conv_relu(xt, adj, w_bd, bias_t, adj_rowsum, extra)
    # TODO(synk): dropout layers (p=0.25) are inference-mode identities.
    logits_row = transformer_pool_head(xt, dev, batch=B)          # (1, B*C)
    return logits_row.reshape(B, -1)


# ---------------------------------------------------------------------------
# Pure-JAX reference (mirrors the PyTorch forward, eval mode)
# ---------------------------------------------------------------------------
def _ref_attention_block(x, p, num_heads, eps):
    L, Nb, E = x.shape
    Dh = E // num_heads
    resid = x
    qkv = x @ p["wqkv"] + p["bqkv"]
    q, k, v = qkv[..., :E], qkv[..., E:2 * E], qkv[..., 2 * E:]
    qh = q.reshape(L, Nb, num_heads, Dh) * (1.0 / Dh ** 0.5)
    kh = k.reshape(L, Nb, num_heads, Dh)
    vh = v.reshape(L, Nb, num_heads, Dh)
    s = jnp.einsum("lnhd,mnhd->nhlm", qh, kh)
    s = s - s.max(axis=-1, keepdims=True)
    pa = jnp.exp(s)
    pa = pa / pa.sum(axis=-1, keepdims=True)
    o = jnp.einsum("nhlm,mnhd->lnhd", pa, vh).reshape(L, Nb, E)
    o = o @ p["wo"] + p["bo"]
    x1 = x + o
    mu = x1.mean(-1, keepdims=True)
    d = x1 - mu
    var = (d * d).mean(-1, keepdims=True)
    xn = d * jax.lax.rsqrt(var + eps) * p["g2"] + p["be2"]
    hdn = xn @ p["w1"] + p["b1"]
    hdn = hdn * (1.0 / (1.0 + jnp.exp(-hdn)))
    y = hdn @ p["w2"] + p["b2"]
    return x1 + y + resid


def _ref_forward(x, adj, params, num_heads, eps=_LN_EPS):
    h = x
    for w_t, b in params["gcn"]:
        h = jnp.maximum(jnp.matmul(adj, jnp.matmul(h, w_t) + b) + h, 0.0)
    h = h + params["pos"][None, :, :]
    for p in params["blocks"]:
        h = _ref_attention_block(h, p, num_heads, eps)
    pooled = h.mean(axis=1)
    hp = params["head"]
    mu = pooled.mean(-1, keepdims=True)
    d = pooled - mu
    var = (d * d).mean(-1, keepdims=True)
    xn = d * jax.lax.rsqrt(var + eps) * hp["g"] + hp["be"]
    return xn @ hp["w"] + hp["b"]


if __name__ == "__main__":
    B, S, F_IN = 2, 16, 4
    EMBED = 4            # GraphConvolution residual forces embed_dim == in_features == 4
    HIDDEN = 16
    HEADS = 2
    LAYERS = 2
    CLASSES = 10         # max_length == S so the pos-emb broadcast add is valid

    key = jax.random.PRNGKey(0)
    kit = iter(jax.random.split(key, 64))

    def unif(shape, bound):
        return jax.random.uniform(next(kit), shape, jnp.float32, -bound, bound)

    x = jax.random.normal(next(kit), (B, S, F_IN), jnp.float32)
    adj_raw = jax.random.uniform(next(kit), (S, S), jnp.float32)
    adj = adj_raw / jnp.sum(adj_raw, axis=-1, keepdims=True)   # row-normalized adjacency

    params = {}
    # Linear weights stored pre-transposed: (in_features, out_features).
    params["gcn"] = []
    for f_in, f_out in ((F_IN, EMBED), (EMBED, EMBED)):
        bound = 1.0 / (f_in ** 0.5)
        params["gcn"].append((unif((f_in, f_out), bound), unif((f_out,), bound)))
    params["pos"] = 0.1 * jax.random.normal(next(kit), (S, EMBED), jnp.float32)

    params["blocks"] = []
    for _ in range(LAYERS):
        be = 1.0 / (EMBED ** 0.5)
        bh = 1.0 / (HIDDEN ** 0.5)
        params["blocks"].append({
            "wqkv": unif((EMBED, 3 * EMBED), be), "bqkv": unif((1, 3 * EMBED), be),
            "wo": unif((EMBED, EMBED), be), "bo": unif((1, EMBED), be),
            "g2": 1.0 + 0.1 * jax.random.normal(next(kit), (1, EMBED), jnp.float32),
            "be2": 0.1 * jax.random.normal(next(kit), (1, EMBED), jnp.float32),
            "w1": unif((EMBED, HIDDEN), be), "b1": unif((1, HIDDEN), be),
            "w2": unif((HIDDEN, EMBED), bh), "b2": unif((1, EMBED), bh),
        })

    params["head"] = {
        "g": 1.0 + 0.1 * jax.random.normal(next(kit), (1, EMBED), jnp.float32),
        "be": 0.1 * jax.random.normal(next(kit), (1, EMBED), jnp.float32),
        "w": unif((EMBED, CLASSES), 1.0 / (EMBED ** 0.5)),
        "b": unif((1, CLASSES), 1.0 / (EMBED ** 0.5)),
    }

    dev_params = prepare_params(params, batch=B, num_heads=HEADS)

    fwd = jax.jit(asl_interpreter_forward)
    logits = jax.block_until_ready(fwd(x, adj, dev_params))

    with jax.default_matmul_precision("highest"):
        ref = _ref_forward(x, adj, params, HEADS)

    assert logits.shape == (B, CLASSES)
    # Tolerance 2e-3: approx-EUP reciprocals (softmax / SiLU denominators)
    # introduce a small, bounded relative error vs the exact-divide reference.
    assert jnp.allclose(logits, ref, atol=2e-3, rtol=2e-3), (
        "mismatch vs reference: max|diff|="
        f"{float(jnp.max(jnp.abs(logits - ref)))}")

    print("KERNEL_OK")
</pallas_src>

<mosaic_0001>
module attributes {stable_mosaic.version = 11 : i64} {
  func.func @_gcn_kernel(%arg0: i32, %arg1: i32, %arg2: memref<16x8xf32, #tpu.memory_space<vmem>>, %arg3: memref<16x8xf32, #tpu.memory_space<vmem>>, %arg4: memref<16x16xf32, #tpu.memory_space<vmem>>, %arg5: memref<8x8xf32, #tpu.memory_space<vmem>>, %arg6: memref<16x1xf32, #tpu.memory_space<vmem>>, %arg7: memref<1x8xf32, #tpu.memory_space<vmem>>, %arg8: memref<16x8xf32, #tpu.memory_space<vmem>>, %arg9: memref<16x8xf32, #tpu.memory_space<vmem>>) attributes {dimension_semantics = [#tpu.dimension_semantics<parallel>, #tpu.dimension_semantics<arbitrary>], iteration_bounds = array<i64: 1, 1>, scalar_prefetch = 0 : i64, scratch_operands = 1 : i64, tpu.core_type = #tpu.core_type<tc>, window_params = [{transform_indices = @transform_0, window_bounds = array<i64: 16, 8>}, {transform_indices = @transform_1, window_bounds = array<i64: 16, 8>}, {transform_indices = @transform_2, window_bounds = array<i64: 16, 16>}, {pipeline_mode = #tpu.pipeline_mode<synchronous>, transform_indices = @transform_3, window_bounds = array<i64: 8, 8>}, {transform_indices = @transform_4, window_bounds = array<i64: 16, 1>}, {pipeline_mode = #tpu.pipeline_mode<synchronous>, transform_indices = @transform_5, window_bounds = array<i64: 1, 8>}, {transform_indices = @transform_6, window_bounds = array<i64: 16, 8>}]} {
    %c0_i32 = arith.constant 0 : i32
    %0 = arith.cmpi eq, %arg1, %c0_i32 : i32
    %1 = arith.extui %0 : i1 to i32
    %c0_i32_0 = arith.constant 0 : i32
    %2 = arith.cmpi ne, %1, %c0_i32_0 : i32
    scf.if %2 {
      %cst_13 = arith.constant 0.000000e+00 : f32
      %14 = vector.broadcast %cst_13 : f32 to vector<16x8xf32>
      %c0_14 = arith.constant 0 : index
      %c0_15 = arith.constant 0 : index
      %15 = vector.load %arg9[%c0_14, %c0_15] : memref<16x8xf32, #tpu.memory_space<vmem>>, vector<16x8xf32>
      tpu.vector_store %arg9[%c0_14, %c0_15], %14 {strides = array<i32>} : memref<16x8xf32, #tpu.memory_space<vmem>>, vector<16x8xf32>,
    } else {
    }
    %c0 = arith.constant 0 : index
    %c0_1 = arith.constant 0 : index
    %3 = vector.load %arg3[%c0, %c0_1] : memref<16x8xf32, #tpu.memory_space<vmem>>, vector<16x8xf32>
    %c0_2 = arith.constant 0 : index
    %c0_3 = arith.constant 0 : index
    %4 = vector.load %arg5[%c0_2, %c0_3] : memref<8x8xf32, #tpu.memory_space<vmem>>, vector<8x8xf32>
    %cst = arith.constant dense<0.000000e+00> : vector<16x8xf32>
    %5 = tpu.matmul %3, %4, %cst {dimension_numbers = #tpu.dot_dimension_numbers<[1], [0], [0], [1], [0, 0, 1, 1], [], []>} : vector<16x8xf32>, vector<8x8xf32>, vector<16x8xf32> -> vector<16x8xf32>
    %c0_4 = arith.constant 0 : index
    %c0_5 = arith.constant 0 : index
    %6 = vector.load %arg9[%c0_4, %c0_5] : memref<16x8xf32, #tpu.memory_space<vmem>>, vector<16x8xf32>
    %c0_6 = arith.constant 0 : index
    %c0_7 = arith.constant 0 : index
    %7 = vector.load %arg4[%c0_6, %c0_7] : memref<16x16xf32, #tpu.memory_space<vmem>>, vector<16x16xf32>
    %cst_8 = arith.constant dense<0.000000e+00> : vector<16x8xf32>
    %8 = tpu.matmul %7, %5, %cst_8 {dimension_numbers = #tpu.dot_dimension_numbers<[1], [0], [0], [1], [0, 0, 1, 1], [], []>} : vector<16x16xf32>, vector<16x8xf32>, vector<16x8xf32> -> vector<16x8xf32>
    %9 = arith.addf %6, %8 : vector<16x8xf32>
    %c0_9 = arith.constant 0 : index
    %c0_10 = arith.constant 0 : index
    %10 = vector.load %arg9[%c0_9, %c0_10] : memref<16x8xf32, #tpu.memory_space<vmem>>, vector<16x8xf32>
    tpu.vector_store %arg9[%c0_9, %c0_10], %9 {strides = array<i32>} : memref<16x8xf32, #tpu.memory_space<vmem>>, vector<16x8xf32>,
    %c0_i32_11 = arith.constant 0 : i32
    %11 = arith.cmpi eq, %arg1, %c0_i32_11 : i32
    %12 = arith.extui %11 : i1 to i32
    %c0_i32_12 = arith.constant 0 : i32
    %13 = arith.cmpi ne, %12, %c0_i32_12 : i32
    scf.if %13 {
      %c0_13 = arith.constant 0 : index
      %c0_14 = arith.constant 0 : index
      %14 = vector.load %arg9[%c0_13, %c0_14] : memref<16x8xf32, #tpu.memory_space<vmem>>, vector<16x8xf32>
      %c0_15 = arith.constant 0 : index
      %c0_16 = arith.constant 0 : index
      %15 = vector.load %arg6[%c0_15, %c0_16] : memref<16x1xf32, #tpu.memory_space<vmem>>, vector<16x1xf32>
      %c0_17 = arith.constant 0 : index
      %c0_18 = arith.constant 0 : index
      %16 = vector.load %arg7[%c0_17, %c0_18] : memref<1x8xf32, #tpu.memory_space<vmem>>, vector<1x8xf32>
      %17 = vector.broadcast %15 : vector<16x1xf32> to vector<16x8xf32>
      %18 = vector.broadcast %16 : vector<1x8xf32> to vector<16x8xf32>
      %19 = arith.mulf %17, %18 : vector<16x8xf32>
      %20 = arith.addf %14, %19 : vector<16x8xf32>
      %c0_19 = arith.constant 0 : index
      %c0_20 = arith.constant 0 : index
      %21 = vector.load %arg2[%c0_19, %c0_20] : memref<16x8xf32, #tpu.memory_space<vmem>>, vector<16x8xf32>
      %22 = arith.addf %20, %21 : vector<16x8xf32>
      %cst_21 = arith.constant 0.000000e+00 : f32
      %23 = vector.broadcast %cst_21 : f32 to vector<16x8xf32>
      %24 = arith.maximumf %22, %23 : vector<16x8xf32>
      %c0_22 = arith.constant 0 : index
      %c0_23 = arith.constant 0 : index
      %25 = vector.load %arg8[%c0_22, %c0_23] : memref<16x8xf32, #tpu.memory_space<vmem>>, vector<16x8xf32>
      tpu.vector_store %arg8[%c0_22, %c0_23], %24 {strides = array<i32>} : memref<16x8xf32, #tpu.memory_space<vmem>>, vector<16x8xf32>,
    } else {
    }
    return
  }
  func.func @transform_0(%arg0: i32, %arg1: i32) -> (i32, i32) {
    %c0_i32 = arith.constant 0 : i32
    %c0_i32_0 = arith.constant 0 : i32
    return %arg0, %c0_i32 : i32, i32
  }
  func.func @transform_1(%arg0: i32, %arg1: i32) -> (i32, i32) {
    %c0_i32 = arith.constant 0 : i32
    %c0_i32_0 = arith.constant 0 : i32
    return %arg1, %c0_i32 : i32, i32
  }
  func.func @transform_2(%arg0: i32, %arg1: i32) -> (i32, i32) {
    %c0_i32 = arith.constant 0 : i32
    return %arg0, %arg1 : i32, i32
  }
  func.func @transform_3(%arg0: i32, %arg1: i32) -> (i32, i32) {
    %c0_i32 = arith.constant 0 : i32
    %c0_i32_0 = arith.constant 0 : i32
    %c0_i32_1 = arith.constant 0 : i32
    return %c0_i32, %c0_i32_0 : i32, i32
  }
  func.func @transform_4(%arg0: i32, %arg1: i32) -> (i32, i32) {
    %c0_i32 = arith.constant 0 : i32
    %c0_i32_0 = arith.constant 0 : i32
    return %arg0, %c0_i32 : i32, i32
  }
  func.func @transform_5(%arg0: i32, %arg1: i32) -> (i32, i32) {
    %c0_i32 = arith.constant 0 : i32
    %c0_i32_0 = arith.constant 0 : i32
    %c0_i32_1 = arith.constant 0 : i32
    return %c0_i32, %c0_i32_0 : i32, i32
  }
  func.func @transform_6(%arg0: i32, %arg1: i32) -> (i32, i32) {
    %c0_i32 = arith.constant 0 : i32
    %c0_i32_0 = arith.constant 0 : i32
    return %arg0, %c0_i32 : i32, i32
  }
}

module attributes {stable_mosaic.version = 11 : i64} {
  func.func @_gcn_kernel_extra(%arg0: i32, %arg1: i32, %arg2: memref<16x8xf32, #tpu.memory_space<vmem>>, %arg3: memref<16x8xf32, #tpu.memory_space<vmem>>, %arg4: memref<16x16xf32, #tpu.memory_space<vmem>>, %arg5: memref<8x8xf32, #tpu.memory_space<vmem>>, %arg6: memref<16x1xf32, #tpu.memory_space<vmem>>, %arg7: memref<1x8xf32, #tpu.memory_space<vmem>>, %arg8: memref<16x8xf32, #tpu.memory_space<vmem>>, %arg9: memref<16x8xf32, #tpu.memory_space<vmem>>, %arg10: memref<16x8xf32, #tpu.memory_space<vmem>>) attributes {dimension_semantics = [#tpu.dimension_semantics<parallel>, #tpu.dimension_semantics<arbitrary>], iteration_bounds = array<i64: 1, 1>, scalar_prefetch = 0 : i64, scratch_operands = 1 : i64, tpu.core_type = #tpu.core_type<tc>, window_params = [{transform_indices = @transform_0, window_bounds = array<i64: 16, 8>}, {transform_indices = @transform_1, window_bounds = array<i64: 16, 8>}, {transform_indices = @transform_2, window_bounds = array<i64: 16, 16>}, {pipeline_mode = #tpu.pipeline_mode<synchronous>, transform_indices = @transform_3, window_bounds = array<i64: 8, 8>}, {transform_indices = @transform_4, window_bounds = array<i64: 16, 1>}, {pipeline_mode = #tpu.pipeline_mode<synchronous>, transform_indices = @transform_5, window_bounds = array<i64: 1, 8>}, {transform_indices = @transform_6, window_bounds = array<i64: 16, 8>}, {transform_indices = @transform_7, window_bounds = array<i64: 16, 8>}]} {
    %c0_i32 = arith.constant 0 : i32
    %0 = arith.cmpi eq, %arg1, %c0_i32 : i32
    %1 = arith.extui %0 : i1 to i32
    %c0_i32_0 = arith.constant 0 : i32
    %2 = arith.cmpi ne, %1, %c0_i32_0 : i32
    scf.if %2 {
      %cst_13 = arith.constant 0.000000e+00 : f32
      %14 = vector.broadcast %cst_13 : f32 to vector<16x8xf32>
      %c0_14 = arith.constant 0 : index
      %c0_15 = arith.constant 0 : index
      %15 = vector.load %arg10[%c0_14, %c0_15] : memref<16x8xf32, #tpu.memory_space<vmem>>, vector<16x8xf32>
      tpu.vector_store %arg10[%c0_14, %c0_15], %14 {strides = array<i32>} : memref<16x8xf32, #tpu.memory_space<vmem>>, vector<16x8xf32>,
    } else {
    }
    %c0 = arith.constant 0 : index
    %c0_1 = arith.constant 0 : index
    %3 = vector.load %arg3[%c0, %c0_1] : memref<16x8xf32, #tpu.memory_space<vmem>>, vector<16x8xf32>
    %c0_2 = arith.constant 0 : index
    %c0_3 = arith.constant 0 : index
    %4 = vector.load %arg5[%c0_2, %c0_3] : memref<8x8xf32, #tpu.memory_space<vmem>>, vector<8x8xf32>
    %cst = arith.constant dense<0.000000e+00> : vector<16x8xf32>
    %5 = tpu.matmul %3, %4, %cst {dimension_numbers = #tpu.dot_dimension_numbers<[1], [0], [0], [1], [0, 0, 1, 1], [], []>} : vector<16x8xf32>, vector<8x8xf32>, vector<16x8xf32> -> vector<16x8xf32>
    %c0_4 = arith.constant 0 : index
    %c0_5 = arith.constant 0 : index
    %6 = vector.load %arg10[%c0_4, %c0_5] : memref<16x8xf32, #tpu.memory_space<vmem>>, vector<16x8xf32>
    %c0_6 = arith.constant 0 : index
    %c0_7 = arith.constant 0 : index
    %7 = vector.load %arg4[%c0_6, %c0_7] : memref<16x16xf32, #tpu.memory_space<vmem>>, vector<16x16xf32>
    %cst_8 = arith.constant dense<0.000000e+00> : vector<16x8xf32>
    %8 = tpu.matmul %7, %5, %cst_8 {dimension_numbers = #tpu.dot_dimension_numbers<[1], [0], [0], [1], [0, 0, 1, 1], [], []>} : vector<16x16xf32>, vector<16x8xf32>, vector<16x8xf32> -> vector<16x8xf32>
    %9 = arith.addf %6, %8 : vector<16x8xf32>
    %c0_9 = arith.constant 0 : index
    %c0_10 = arith.constant 0 : index
    %10 = vector.load %arg10[%c0_9, %c0_10] : memref<16x8xf32, #tpu.memory_space<vmem>>, vector<16x8xf32>
    tpu.vector_store %arg10[%c0_9, %c0_10], %9 {strides = array<i32>} : memref<16x8xf32, #tpu.memory_space<vmem>>, vector<16x8xf32>,
    %c0_i32_11 = arith.constant 0 : i32
    %11 = arith.cmpi eq, %arg1, %c0_i32_11 : i32
    %12 = arith.extui %11 : i1 to i32
    %c0_i32_12 = arith.constant 0 : i32
    %13 = arith.cmpi ne, %12, %c0_i32_12 : i32
    scf.if %13 {
      %c0_13 = arith.constant 0 : index
      %c0_14 = arith.constant 0 : index
      %14 = vector.load %arg10[%c0_13, %c0_14] : memref<16x8xf32, #tpu.memory_space<vmem>>, vector<16x8xf32>
      %c0_15 = arith.constant 0 : index
      %c0_16 = arith.constant 0 : index
      %15 = vector.load %arg6[%c0_15, %c0_16] : memref<16x1xf32, #tpu.memory_space<vmem>>, vector<16x1xf32>
      %c0_17 = arith.constant 0 : index
      %c0_18 = arith.constant 0 : index
      %16 = vector.load %arg7[%c0_17, %c0_18] : memref<1x8xf32, #tpu.memory_space<vmem>>, vector<1x8xf32>
      %17 = vector.broadcast %15 : vector<16x1xf32> to vector<16x8xf32>
      %18 = vector.broadcast %16 : vector<1x8xf32> to vector<16x8xf32>
      %19 = arith.mulf %17, %18 : vector<16x8xf32>
      %20 = arith.addf %14, %19 : vector<16x8xf32>
      %c0_19 = arith.constant 0 : index
      %c0_20 = arith.constant 0 : index
      %21 = vector.load %arg2[%c0_19, %c0_20] : memref<16x8xf32, #tpu.memory_space<vmem>>, vector<16x8xf32>
      %22 = arith.addf %20, %21 : vector<16x8xf32>
      %cst_21 = arith.constant 0.000000e+00 : f32
      %23 = vector.broadcast %cst_21 : f32 to vector<16x8xf32>
      %24 = arith.maximumf %22, %23 : vector<16x8xf32>
      %c0_22 = arith.constant 0 : index
      %c0_23 = arith.constant 0 : index
      %25 = vector.load %arg8[%c0_22, %c0_23] : memref<16x8xf32, #tpu.memory_space<vmem>>, vector<16x8xf32>
      %26 = arith.addf %24, %25 : vector<16x8xf32>
      %c0_24 = arith.constant 0 : index
      %c0_25 = arith.constant 0 : index
      %27 = vector.load %arg9[%c0_24, %c0_25] : memref<16x8xf32, #tpu.memory_space<vmem>>, vector<16x8xf32>
      tpu.vector_store %arg9[%c0_24, %c0_25], %26 {strides = array<i32>} : memref<16x8xf32, #tpu.memory_space<vmem>>, vector<16x8xf32>,
    } else {
    }
    return
  }
  func.func @transform_0(%arg0: i32, %arg1: i32) -> (i32, i32) {
    %c0_i32 = arith.constant 0 : i32
    %c0_i32_0 = arith.constant 0 : i32
    return %arg0, %c0_i32 : i32, i32
  }
  func.func @transform_1(%arg0: i32, %arg1: i32) -> (i32, i32) {
    %c0_i32 = arith.constant 0 : i32
    %c0_i32_0 = arith.constant 0 : i32
    return %arg1, %c0_i32 : i32, i32
  }
  func.func @transform_2(%arg0: i32, %arg1: i32) -> (i32, i32) {
    %c0_i32 = arith.constant 0 : i32
    return %arg0, %arg1 : i32, i32
  }
  func.func @transform_3(%arg0: i32, %arg1: i32) -> (i32, i32) {
    %c0_i32 = arith.constant 0 : i32
    %c0_i32_0 = arith.constant 0 : i32
    %c0_i32_1 = arith.constant 0 : i32
    return %c0_i32, %c0_i32_0 : i32, i32
  }
  func.func @transform_4(%arg0: i32, %arg1: i32) -> (i32, i32) {
    %c0_i32 = arith.constant 0 : i32
    %c0_i32_0 = arith.constant 0 : i32
    return %arg0, %c0_i32 : i32, i32
  }
  func.func @transform_5(%arg0: i32, %arg1: i32) -> (i32, i32) {
    %c0_i32 = arith.constant 0 : i32
    %c0_i32_0 = arith.constant 0 : i32
    %c0_i32_1 = arith.constant 0 : i32
    return %c0_i32, %c0_i32_0 : i32, i32
  }
  func.func @transform_6(%arg0: i32, %arg1: i32) -> (i32, i32) {
    %c0_i32 = arith.constant 0 : i32
    %c0_i32_0 = arith.constant 0 : i32
    return %arg0, %c0_i32 : i32, i32
  }
  func.func @transform_7(%arg0: i32, %arg1: i32) -> (i32, i32) {
    %c0_i32 = arith.constant 0 : i32
    %c0_i32_0 = arith.constant 0 : i32
    return %arg0, %c0_i32 : i32, i32
  }
}

module attributes {stable_mosaic.version = 11 : i64} {
  func.func @_transformer_pool_head_kernel(%arg0: i32, %arg1: memref<16x8xf32, #tpu.memory_space<vmem>>, %arg2: memref<2x8x24xf32, #tpu.memory_space<vmem>>, %arg3: memref<2x1x24xf32, #tpu.memory_space<vmem>>, %arg4: memref<2x8x8xf32, #tpu.memory_space<vmem>>, %arg5: memref<2x1x8xf32, #tpu.memory_space<vmem>>, %arg6: memref<2x1x8xf32, #tpu.memory_space<vmem>>, %arg7: memref<2x1x8xf32, #tpu.memory_space<vmem>>, %arg8: memref<2x8x32xf32, #tpu.memory_space<vmem>>, %arg9: memref<2x1x32xf32, #tpu.memory_space<vmem>>, %arg10: memref<2x32x8xf32, #tpu.memory_space<vmem>>, %arg11: memref<2x1x8xf32, #tpu.memory_space<vmem>>, %arg12: memref<4x2xf32, #tpu.memory_space<vmem>>, %arg13: memref<2x4xf32, #tpu.memory_space<vmem>>, %arg14: memref<8x8xf32, #tpu.memory_space<vmem>>, %arg15: memref<1x8xf32, #tpu.memory_space<vmem>>, %arg16: memref<1x8xf32, #tpu.memory_space<vmem>>, %arg17: memref<8x20xf32, #tpu.memory_space<vmem>>, %arg18: memref<1x20xf32, #tpu.memory_space<vmem>>, %arg19: memref<1x20xf32, #tpu.memory_space<vmem>>, %arg20: memref<1x8xf32, #tpu.memory_space<vmem>>) attributes {dimension_semantics = [#tpu.dimension_semantics<arbitrary>], iteration_bounds = array<i64: 1>, scalar_prefetch = 0 : i64, scratch_operands = 1 : i64, tpu.core_type = #tpu.core_type<tc>, window_params = [{transform_indices = @transform_0, window_bounds = array<i64: 16, 8>}, {pipeline_mode = #tpu.pipeline_mode<synchronous>, transform_indices = @transform_1, window_bounds = array<i64: 2, 8, 24>}, {pipeline_mode = #tpu.pipeline_mode<synchronous>, transform_indices = @transform_2, window_bounds = array<i64: 2, 1, 24>}, {pipeline_mode = #tpu.pipeline_mode<synchronous>, transform_indices = @transform_3, window_bounds = array<i64: 2, 8, 8>}, {pipeline_mode = #tpu.pipeline_mode<synchronous>, transform_indices = @transform_4, window_bounds = array<i64: 2, 1, 8>}, {pipeline_mode = #tpu.pipeline_mode<synchronous>, transform_indices = @transform_5, window_bounds = array<i64: 2, 1, 8>}, {pipeline_mode = #tpu.pipeline_mode<synchronous>, transform_indices = @transform_6, window_bounds = array<i64: 2, 1, 8>}, {pipeline_mode = #tpu.pipeline_mode<synchronous>, transform_indices = @transform_7, window_bounds = array<i64: 2, 8, 32>}, {pipeline_mode = #tpu.pipeline_mode<synchronous>, transform_indices = @transform_8, window_bounds = array<i64: 2, 1, 32>}, {pipeline_mode = #tpu.pipeline_mode<synchronous>, transform_indices = @transform_9, window_bounds = array<i64: 2, 32, 8>}, {pipeline_mode = #tpu.pipeline_mode<synchronous>, transform_indices = @transform_10, window_bounds = array<i64: 2, 1, 8>}, {pipeline_mode = #tpu.pipeline_mode<synchronous>, transform_indices = @transform_11, window_bounds = array<i64: 4, 2>}, {pipeline_mode = #tpu.pipeline_mode<synchronous>, transform_indices = @transform_12, window_bounds = array<i64: 2, 4>}, {pipeline_mode = #tpu.pipeline_mode<synchronous>, transform_indices = @transform_13, window_bounds = array<i64: 8, 8>}, {pipeline_mode = #tpu.pipeline_mode<synchronous>, transform_indices = @transform_14, window_bounds = array<i64: 1, 8>}, {pipeline_mode = #tpu.pipeline_mode<synchronous>, transform_indices = @transform_15, window_bounds = array<i64: 1, 8>}, {pipeline_mode = #tpu.pipeline_mode<synchronous>, transform_indices = @transform_16, window_bounds = array<i64: 8, 20>}, {pipeline_mode = #tpu.pipeline_mode<synchronous>, transform_indices = @transform_17, window_bounds = array<i64: 1, 20>}, {pipeline_mode = #tpu.pipeline_mode<synchronous>, transform_indices = @transform_18, window_bounds = array<i64: 1, 20>}]} {
    %c0_i32 = arith.constant 0 : i32
    %0 = arith.cmpi eq, %arg0, %c0_i32 : i32
    %1 = arith.extui %0 : i1 to i32
    %c0_i32_0 = arith.constant 0 : i32
    %2 = arith.cmpi ne, %1, %c0_i32_0 : i32
    scf.if %2 {
      %cst_111 = arith.constant 0.000000e+00 : f32
      %217 = vector.broadcast %cst_111 : f32 to vector<1x8xf32>
      %c0_112 = arith.constant 0 : index
      %c0_113 = arith.constant 0 : index
      %218 = vector.load %arg20[%c0_112, %c0_113] : memref<1x8xf32, #tpu.memory_space<vmem>>, vector<1x8xf32>
      tpu.vector_store %arg20[%c0_112, %c0_113], %217 {strides = array<i32>} : memref<1x8xf32, #tpu.memory_space<vmem>>, vector<1x8xf32>,
    } else {
    }
    %c0 = arith.constant 0 : index
    %c0_1 = arith.constant 0 : index
    %3 = vector.load %arg12[%c0, %c0_1] : memref<4x2xf32, #tpu.memory_space<vmem>>, vector<4x2xf32>
    %c0_2 = arith.constant 0 : index
    %c0_3 = arith.constant 0 : index
    %4 = vector.load %arg13[%c0_2, %c0_3] : memref<2x4xf32, #tpu.memory_space<vmem>>, vector<2x4xf32>
    %c0_4 = arith.constant 0 : index
    %c0_5 = arith.constant 0 : index
    %5 = vector.load %arg14[%c0_4, %c0_5] : memref<8x8xf32, #tpu.memory_space<vmem>>, vector<8x8xf32>
    %c0_6 = arith.constant 0 : index
    %c0_7 = arith.constant 0 : index
    %6 = vector.load %arg1[%c0_6, %c0_7] : memref<16x8xf32, #tpu.memory_space<vmem>>, vector<16x8xf32>
    %c0_8 = arith.constant 0 : index
    %c0_9 = arith.constant 0 : index
    %c0_10 = arith.constant 0 : index
    %7 = vector.load %arg2[%c0_8, %c0_9, %c0_10] : memref<2x8x24xf32, #tpu.memory_space<vmem>>, vector<1x8x24xf32>
    %8 = vector.shape_cast %7 : vector<1x8x24xf32> to vector<8x24xf32>
    %c0_11 = arith.constant 0 : index
    %c0_12 = arith.constant 0 : index
    %c0_13 = arith.constant 0 : index
    %9 = vector.load %arg3[%c0_11, %c0_12, %c0_13] : memref<2x1x24xf32, #tpu.memory_space<vmem>>, vector<1x1x24xf32>
    %10 = vector.shape_cast %9 : vector<1x1x24xf32> to vector<1x24xf32>
    %c0_14 = arith.constant 0 : index
    %c0_15 = arith.constant 0 : index
    %c0_16 = arith.constant 0 : index
    %11 = vector.load %arg4[%c0_14, %c0_15, %c0_16] : memref<2x8x8xf32, #tpu.memory_space<vmem>>, vector<1x8x8xf32>
    %12 = vector.shape_cast %11 : vector<1x8x8xf32> to vector<8x8xf32>
    %c0_17 = arith.constant 0 : index
    %c0_18 = arith.constant 0 : index
    %c0_19 = arith.constant 0 : index
    %13 = vector.load %arg5[%c0_17, %c0_18, %c0_19] : memref<2x1x8xf32, #tpu.memory_space<vmem>>, vector<1x1x8xf32>
    %14 = vector.shape_cast %13 : vector<1x1x8xf32> to vector<1x8xf32>
    %c0_20 = arith.constant 0 : index
    %c0_21 = arith.constant 0 : index
    %c0_22 = arith.constant 0 : index
    %15 = vector.load %arg6[%c0_20, %c0_21, %c0_22] : memref<2x1x8xf32, #tpu.memory_space<vmem>>, vector<1x1x8xf32>
    %16 = vector.shape_cast %15 : vector<1x1x8xf32> to vector<1x8xf32>
    %c0_23 = arith.constant 0 : index
    %c0_24 = arith.constant 0 : index
    %c0_25 = arith.constant 0 : index
    %17 = vector.load %arg7[%c0_23, %c0_24, %c0_25] : memref<2x1x8xf32, #tpu.memory_space<vmem>>, vector<1x1x8xf32>
    %18 = vector.shape_cast %17 : vector<1x1x8xf32> to vector<1x8xf32>
    %c0_26 = arith.constant 0 : index
    %c0_27 = arith.constant 0 : index
    %c0_28 = arith.constant 0 : index
    %19 = vector.load %arg8[%c0_26, %c0_27, %c0_28] : memref<2x8x32xf32, #tpu.memory_space<vmem>>, vector<1x8x32xf32>
    %20 = vector.shape_cast %19 : vector<1x8x32xf32> to vector<8x32xf32>
    %c0_29 = arith.constant 0 : index
    %c0_30 = arith.constant 0 : index
    %c0_31 = arith.constant 0 : index
    %21 = vector.load %arg9[%c0_29, %c0_30, %c0_31] : memref<2x1x32xf32, #tpu.memory_space<vmem>>, vector<1x1x32xf32>
    %22 = vector.shape_cast %21 : vector<1x1x32xf32> to vector<1x32xf32>
    %c0_32 = arith.constant 0 : index
    %c0_33 = arith.constant 0 : index
    %c0_34 = arith.constant 0 : index
    %23 = vector.load %arg10[%c0_32, %c0_33, %c0_34] : memref<2x32x8xf32, #tpu.memory_space<vmem>>, vector<1x32x8xf32>
    %24 = vector.shape_cast %23 : vector<1x32x8xf32> to vector<32x8xf32>
    %c0_35 = arith.constant 0 : index
    %c0_36 = arith.constant 0 : index
    %c0_37 = arith.constant 0 : index
    %25 = vector.load %arg11[%c0_35, %c0_36, %c0_37] : memref<2x1x8xf32, #tpu.memory_space<vmem>>, vector<1x1x8xf32>
    %26 = vector.shape_cast %25 : vector<1x1x8xf32> to vector<1x8xf32>
    %cst = arith.constant dense<0.000000e+00> : vector<16x24xf32>
    %27 = tpu.matmul %6, %8, %cst {dimension_numbers = #tpu.dot_dimension_numbers<[1], [0], [0], [1], [0, 0, 1, 1], [], []>} : vector<16x8xf32>, vector<8x24xf32>, vector<16x24xf32> -> vector<16x24xf32>
    %28 = vector.broadcast %10 : vector<1x24xf32> to vector<16x24xf32>
    %29 = arith.addf %27, %28 : vector<16x24xf32>
    %30 = vector.extract_strided_slice %29 {offsets = [0, 0], sizes = [16, 4], strides = [1, 1]} : vector<16x24xf32> to vector<16x4xf32>
    %31 = vector.extract_strided_slice %29 {offsets = [0, 12], sizes = [16, 4], strides = [1, 1]} : vector<16x24xf32> to vector<16x4xf32>
    %32 = vector.extract_strided_slice %29 {offsets = [0, 4], sizes = [16, 4], strides = [1, 1]} : vector<16x24xf32> to vector<16x4xf32>
    %33 = vector.extract_strided_slice %29 {offsets = [0, 16], sizes = [16, 4], strides = [1, 1]} : vector<16x24xf32> to vector<16x4xf32>
    %34 = vector.extract_strided_slice %29 {offsets = [0, 8], sizes = [16, 4], strides = [1, 1]} : vector<16x24xf32> to vector<16x4xf32>
    %35 = vector.extract_strided_slice %29 {offsets = [0, 20], sizes = [16, 4], strides = [1, 1]} : vector<16x24xf32> to vector<16x4xf32>
    %36 = arith.mulf %30, %32 : vector<16x4xf32>
    %cst_38 = arith.constant dense<0.000000e+00> : vector<16x2xf32>
    %37 = tpu.matmul %36, %3, %cst_38 {dimension_numbers = #tpu.dot_dimension_numbers<[1], [0], [0], [1], [0, 0, 1, 1], [], []>} : vector<16x4xf32>, vector<4x2xf32>, vector<16x2xf32> -> vector<16x2xf32>
    %38 = arith.mulf %30, %33 : vector<16x4xf32>
    %cst_39 = arith.constant dense<0.000000e+00> : vector<16x2xf32>
    %39 = tpu.matmul %38, %3, %cst_39 {dimension_numbers = #tpu.dot_dimension_numbers<[1], [0], [0], [1], [0, 0, 1, 1], [], []>} : vector<16x4xf32>, vector<4x2xf32>, vector<16x2xf32> -> vector<16x2xf32>
    %40 = arith.maximumf %37, %39 : vector<16x2xf32>
    %41 = arith.subf %37, %40 : vector<16x2xf32>
    %42 = math.exp %41 : vector<16x2xf32>
    %43 = arith.subf %39, %40 : vector<16x2xf32>
    %44 = math.exp %43 : vector<16x2xf32>
    %45 = arith.addf %42, %44 : vector<16x2xf32>
    %46 = tpu.reciprocal %45 {approx = true} : vector<16x2xf32> -> vector<16x2xf32>
    %cst_40 = arith.constant 0.000000e+00 : f32
    %47 = vector.broadcast %cst_40 : f32 to vector<16x4xf32>
    %48 = arith.mulf %42, %46 : vector<16x2xf32>
    %cst_41 = arith.constant dense<0.000000e+00> : vector<16x4xf32>
    %49 = tpu.matmul %48, %4, %cst_41 {dimension_numbers = #tpu.dot_dimension_numbers<[1], [0], [0], [1], [0, 0, 1, 1], [], []>} : vector<16x2xf32>, vector<2x4xf32>, vector<16x4xf32> -> vector<16x4xf32>
    %50 = arith.mulf %49, %34 : vector<16x4xf32>
    %51 = arith.addf %47, %50 : vector<16x4xf32>
    %52 = arith.mulf %44, %46 : vector<16x2xf32>
    %cst_42 = arith.constant dense<0.000000e+00> : vector<16x4xf32>
    %53 = tpu.matmul %52, %4, %cst_42 {dimension_numbers = #tpu.dot_dimension_numbers<[1], [0], [0], [1], [0, 0, 1, 1], [], []>} : vector<16x2xf32>, vector<2x4xf32>, vector<16x4xf32> -> vector<16x4xf32>
    %54 = arith.mulf %53, %35 : vector<16x4xf32>
    %55 = arith.addf %51, %54 : vector<16x4xf32>
    %56 = arith.mulf %31, %32 : vector<16x4xf32>
    %cst_43 = arith.constant dense<0.000000e+00> : vector<16x2xf32>
    %57 = tpu.matmul %56, %3, %cst_43 {dimension_numbers = #tpu.dot_dimension_numbers<[1], [0], [0], [1], [0, 0, 1, 1], [], []>} : vector<16x4xf32>, vector<4x2xf32>, vector<16x2xf32> -> vector<16x2xf32>
    %58 = arith.mulf %31, %33 : vector<16x4xf32>
    %cst_44 = arith.constant dense<0.000000e+00> : vector<16x2xf32>
    %59 = tpu.matmul %58, %3, %cst_44 {dimension_numbers = #tpu.dot_dimension_numbers<[1], [0], [0], [1], [0, 0, 1, 1], [], []>} : vector<16x4xf32>, vector<4x2xf32>, vector<16x2xf32> -> vector<16x2xf32>
    %60 = arith.maximumf %57, %59 : vector<16x2xf32>
    %61 = arith.subf %57, %60 : vector<16x2xf32>
    %62 = math.exp %61 : vector<16x2xf32>
    %63 = arith.subf %59, %60 : vector<16x2xf32>
    %64 = math.exp %63 : vector<16x2xf32>
    %65 = arith.addf %62, %64 : vector<16x2xf32>
    %66 = tpu.reciprocal %65 {approx = true} : vector<16x2xf32> -> vector<16x2xf32>
    %cst_45 = arith.constant 0.000000e+00 : f32
    %67 = vector.broadcast %cst_45 : f32 to vector<16x4xf32>
    %68 = arith.mulf %62, %66 : vector<16x2xf32>
    %cst_46 = arith.constant dense<0.000000e+00> : vector<16x4xf32>
    %69 = tpu.matmul %68, %4, %cst_46 {dimension_numbers = #tpu.dot_dimension_numbers<[1], [0], [0], [1], [0, 0, 1, 1], [], []>} : vector<16x2xf32>, vector<2x4xf32>, vector<16x4xf32> -> vector<16x4xf32>
    %70 = arith.mulf %69, %34 : vector<16x4xf32>
    %71 = arith.addf %67, %70 : vector<16x4xf32>
    %72 = arith.mulf %64, %66 : vector<16x2xf32>
    %cst_47 = arith.constant dense<0.000000e+00> : vector<16x4xf32>
    %73 = tpu.matmul %72, %4, %cst_47 {dimension_numbers = #tpu.dot_dimension_numbers<[1], [0], [0], [1], [0, 0, 1, 1], [], []>} : vector<16x2xf32>, vector<2x4xf32>, vector<16x4xf32> -> vector<16x4xf32>
    %74 = arith.mulf %73, %35 : vector<16x4xf32>
    %75 = arith.addf %71, %74 : vector<16x4xf32>
    %76 = tpu.concatenate %55, %75 in 1 : vector<16x4xf32>, vector<16x4xf32> -> vector<16x8xf32>
    %cst_48 = arith.constant dense<0.000000e+00> : vector<16x8xf32>
    %77 = tpu.matmul %76, %12, %cst_48 {dimension_numbers = #tpu.dot_dimension_numbers<[1], [0], [0], [1], [0, 0, 1, 1], [], []>} : vector<16x8xf32>, vector<8x8xf32>, vector<16x8xf32> -> vector<16x8xf32>
    %78 = vector.broadcast %14 : vector<1x8xf32> to vector<16x8xf32>
    %79 = arith.addf %77, %78 : vector<16x8xf32>
    %80 = arith.addf %6, %79 : vector<16x8xf32>
    %cst_49 = arith.constant dense<0.000000e+00> : vector<16x8xf32>
    %81 = tpu.matmul %80, %5, %cst_49 {dimension_numbers = #tpu.dot_dimension_numbers<[1], [0], [0], [1], [0, 0, 1, 1], [], []>} : vector<16x8xf32>, vector<8x8xf32>, vector<16x8xf32> -> vector<16x8xf32>
    %82 = arith.subf %80, %81 : vector<16x8xf32>
    %83 = arith.mulf %82, %82 : vector<16x8xf32>
    %cst_50 = arith.constant dense<0.000000e+00> : vector<16x8xf32>
    %84 = tpu.matmul %83, %5, %cst_50 {dimension_numbers = #tpu.dot_dimension_numbers<[1], [0], [0], [1], [0, 0, 1, 1], [], []>} : vector<16x8xf32>, vector<8x8xf32>, vector<16x8xf32> -> vector<16x8xf32>
    %cst_51 = arith.constant 9.99999974E-6 : f32
    %85 = vector.broadcast %cst_51 : f32 to vector<16x8xf32>
    %86 = arith.addf %84, %85 : vector<16x8xf32>
    %87 = math.rsqrt %86 : vector<16x8xf32>
    %88 = arith.mulf %82, %87 : vector<16x8xf32>
    %89 = vector.broadcast %16 : vector<1x8xf32> to vector<16x8xf32>
    %90 = arith.mulf %88, %89 : vector<16x8xf32>
    %91 = vector.broadcast %18 : vector<1x8xf32> to vector<16x8xf32>
    %92 = arith.addf %90, %91 : vector<16x8xf32>
    %cst_52 = arith.constant dense<0.000000e+00> : vector<16x32xf32>
    %93 = tpu.matmul %92, %20, %cst_52 {dimension_numbers = #tpu.dot_dimension_numbers<[1], [0], [0], [1], [0, 0, 1, 1], [], []>} : vector<16x8xf32>, vector<8x32xf32>, vector<16x32xf32> -> vector<16x32xf32>
    %94 = vector.broadcast %22 : vector<1x32xf32> to vector<16x32xf32>
    %95 = arith.addf %93, %94 : vector<16x32xf32>
    %cst_53 = arith.constant 0.000000e+00 : f32
    %96 = vector.broadcast %cst_53 : f32 to vector<16x32xf32>
    %97 = arith.subf %96, %95 : vector<16x32xf32>
    %98 = math.exp %97 : vector<16x32xf32>
    %cst_54 = arith.constant 1.000000e+00 : f32
    %99 = vector.broadcast %cst_54 : f32 to vector<16x32xf32>
    %100 = arith.addf %99, %98 : vector<16x32xf32>
    %101 = tpu.reciprocal %100 {approx = true} : vector<16x32xf32> -> vector<16x32xf32>
    %102 = arith.mulf %95, %101 : vector<16x32xf32>
    %cst_55 = arith.constant dense<0.000000e+00> : vector<16x8xf32>
    %103 = tpu.matmul %102, %24, %cst_55 {dimension_numbers = #tpu.dot_dimension_numbers<[1], [0], [0], [1], [0, 0, 1, 1], [], []>} : vector<16x32xf32>, vector<32x8xf32>, vector<16x8xf32> -> vector<16x8xf32>
    %104 = vector.broadcast %26 : vector<1x8xf32> to vector<16x8xf32>
    %105 = arith.addf %103, %104 : vector<16x8xf32>
    %106 = arith.addf %80, %105 : vector<16x8xf32>
    %107 = arith.addf %106, %6 : vector<16x8xf32>
    %c1 = arith.constant 1 : index
    %c0_56 = arith.constant 0 : index
    %c0_57 = arith.constant 0 : index
    %108 = vector.load %arg2[%c1, %c0_56, %c0_57] : memref<2x8x24xf32, #tpu.memory_space<vmem>>, vector<1x8x24xf32>
    %109 = vector.shape_cast %108 : vector<1x8x24xf32> to vector<8x24xf32>
    %c1_58 = arith.constant 1 : index
    %c0_59 = arith.constant 0 : index
    %c0_60 = arith.constant 0 : index
    %110 = vector.load %arg3[%c1_58, %c0_59, %c0_60] : memref<2x1x24xf32, #tpu.memory_space<vmem>>, vector<1x1x24xf32>
    %111 = vector.shape_cast %110 : vector<1x1x24xf32> to vector<1x24xf32>
    %c1_61 = arith.constant 1 : index
    %c0_62 = arith.constant 0 : index
    %c0_63 = arith.constant 0 : index
    %112 = vector.load %arg4[%c1_61, %c0_62, %c0_63] : memref<2x8x8xf32, #tpu.memory_space<vmem>>, vector<1x8x8xf32>
    %113 = vector.shape_cast %112 : vector<1x8x8xf32> to vector<8x8xf32>
    %c1_64 = arith.constant 1 : index
    %c0_65 = arith.constant 0 : index
    %c0_66 = arith.constant 0 : index
    %114 = vector.load %arg5[%c1_64, %c0_65, %c0_66] : memref<2x1x8xf32, #tpu.memory_space<vmem>>, vector<1x1x8xf32>
    %115 = vector.shape_cast %114 : vector<1x1x8xf32> to vector<1x8xf32>
    %c1_67 = arith.constant 1 : index
    %c0_68 = arith.constant 0 : index
    %c0_69 = arith.constant 0 : index
    %116 = vector.load %arg6[%c1_67, %c0_68, %c0_69] : memref<2x1x8xf32, #tpu.memory_space<vmem>>, vector<1x1x8xf32>
    %117 = vector.shape_cast %116 : vector<1x1x8xf32> to vector<1x8xf32>
    %c1_70 = arith.constant 1 : index
    %c0_71 = arith.constant 0 : index
    %c0_72 = arith.constant 0 : index
    %118 = vector.load %arg7[%c1_70, %c0_71, %c0_72] : memref<2x1x8xf32, #tpu.memory_space<vmem>>, vector<1x1x8xf32>
    %119 = vector.shape_cast %118 : vector<1x1x8xf32> to vector<1x8xf32>
    %c1_73 = arith.constant 1 : index
    %c0_74 = arith.constant 0 : index
    %c0_75 = arith.constant 0 : index
    %120 = vector.load %arg8[%c1_73, %c0_74, %c0_75] : memref<2x8x32xf32, #tpu.memory_space<vmem>>, vector<1x8x32xf32>
    %121 = vector.shape_cast %120 : vector<1x8x32xf32> to vector<8x32xf32>
    %c1_76 = arith.constant 1 : index
    %c0_77 = arith.constant 0 : index
    %c0_78 = arith.constant 0 : index
    %122 = vector.load %arg9[%c1_76, %c0_77, %c0_78] : memref<2x1x32xf32, #tpu.memory_space<vmem>>, vector<1x1x32xf32>
    %123 = vector.shape_cast %122 : vector<1x1x32xf32> to vector<1x32xf32>
    %c1_79 = arith.constant 1 : index
    %c0_80 = arith.constant 0 : index
    %c0_81 = arith.constant 0 : index
    %124 = vector.load %arg10[%c1_79, %c0_80, %c0_81] : memref<2x32x8xf32, #tpu.memory_space<vmem>>, vector<1x32x8xf32>
    %125 = vector.shape_cast %124 : vector<1x32x8xf32> to vector<32x8xf32>
    %c1_82 = arith.constant 1 : index
    %c0_83 = arith.constant 0 : index
    %c0_84 = arith.constant 0 : index
    %126 = vector.load %arg11[%c1_82, %c0_83, %c0_84] : memref<2x1x8xf32, #tpu.memory_space<vmem>>, vector<1x1x8xf32>
    %127 = vector.shape_cast %126 : vector<1x1x8xf32> to vector<1x8xf32>
    %cst_85 = arith.constant dense<0.000000e+00> : vector<16x24xf32>
    %128 = tpu.matmul %107, %109, %cst_85 {dimension_numbers = #tpu.dot_dimension_numbers<[1], [0], [0], [1], [0, 0, 1, 1], [], []>} : vector<16x8xf32>, vector<8x24xf32>, vector<16x24xf32> -> vector<16x24xf32>
    %129 = vector.broadcast %111 : vector<1x24xf32> to vector<16x24xf32>
    %130 = arith.addf %128, %129 : vector<16x24xf32>
    %131 = vector.extract_strided_slice %130 {offsets = [0, 0], sizes = [16, 4], strides = [1, 1]} : vector<16x24xf32> to vector<16x4xf32>
    %132 = vector.extract_strided_slice %130 {offsets = [0, 12], sizes = [16, 4], strides = [1, 1]} : vector<16x24xf32> to vector<16x4xf32>
    %133 = vector.extract_strided_slice %130 {offsets = [0, 4], sizes = [16, 4], strides = [1, 1]} : vector<16x24xf32> to vector<16x4xf32>
    %134 = vector.extract_strided_slice %130 {offsets = [0, 16], sizes = [16, 4], strides = [1, 1]} : vector<16x24xf32> to vector<16x4xf32>
    %135 = vector.extract_strided_slice %130 {offsets = [0, 8], sizes = [16, 4], strides = [1, 1]} : vector<16x24xf32> to vector<16x4xf32>
    %136 = vector.extract_strided_slice %130 {offsets = [0, 20], sizes = [16, 4], strides = [1, 1]} : vector<16x24xf32> to vector<16x4xf32>
    %137 = arith.mulf %131, %133 : vector<16x4xf32>
    %cst_86 = arith.constant dense<0.000000e+00> : vector<16x2xf32>
    %138 = tpu.matmul %137, %3, %cst_86 {dimension_numbers = #tpu.dot_dimension_numbers<[1], [0], [0], [1], [0, 0, 1, 1], [], []>} : vector<16x4xf32>, vector<4x2xf32>, vector<16x2xf32> -> vector<16x2xf32>
    %139 = arith.mulf %131, %134 : vector<16x4xf32>
    %cst_87 = arith.constant dense<0.000000e+00> : vector<16x2xf32>
    %140 = tpu.matmul %139, %3, %cst_87 {dimension_numbers = #tpu.dot_dimension_numbers<[1], [0], [0], [1], [0, 0, 1, 1], [], []>} : vector<16x4xf32>, vector<4x2xf32>, vector<16x2xf32> -> vector<16x2xf32>
    %141 = arith.maximumf %138, %140 : vector<16x2xf32>
    %142 = arith.subf %138, %141 : vector<16x2xf32>
    %143 = math.exp %142 : vector<16x2xf32>
    %144 = arith.subf %140, %141 : vector<16x2xf32>
    %145 = math.exp %144 : vector<16x2xf32>
    %146 = arith.addf %143, %145 : vector<16x2xf32>
    %147 = tpu.reciprocal %146 {approx = true} : vector<16x2xf32> -> vector<16x2xf32>
    %cst_88 = arith.constant 0.000000e+00 : f32
    %148 = vector.broadcast %cst_88 : f32 to vector<16x4xf32>
    %149 = arith.mulf %143, %147 : vector<16x2xf32>
    %cst_89 = arith.constant dense<0.000000e+00> : vector<16x4xf32>
    %150 = tpu.matmul %149, %4, %cst_89 {dimension_numbers = #tpu.dot_dimension_numbers<[1], [0], [0], [1], [0, 0, 1, 1], [], []>} : vector<16x2xf32>, vector<2x4xf32>, vector<16x4xf32> -> vector<16x4xf32>
    %151 = arith.mulf %150, %135 : vector<16x4xf32>
    %152 = arith.addf %148, %151 : vector<16x4xf32>
    %153 = arith.mulf %145, %147 : vector<16x2xf32>
    %cst_90 = arith.constant dense<0.000000e+00> : vector<16x4xf32>
    %154 = tpu.matmul %153, %4, %cst_90 {dimension_numbers = #tpu.dot_dimension_numbers<[1], [0], [0], [1], [0, 0, 1, 1], [], []>} : vector<16x2xf32>, vector<2x4xf32>, vector<16x4xf32> -> vector<16x4xf32>
    %155 = arith.mulf %154, %136 : vector<16x4xf32>
    %156 = arith.addf %152, %155 : vector<16x4xf32>
    %157 = arith.mulf %132, %133 : vector<16x4xf32>
    %cst_91 = arith.constant dense<0.000000e+00> : vector<16x2xf32>
    %158 = tpu.matmul %157, %3, %cst_91 {dimension_numbers = #tpu.dot_dimension_numbers<[1], [0], [0], [1], [0, 0, 1, 1], [], []>} : vector<16x4xf32>, vector<4x2xf32>, vector<16x2xf32> -> vector<16x2xf32>
    %159 = arith.mulf %132, %134 : vector<16x4xf32>
    %cst_92 = arith.constant dense<0.000000e+00> : vector<16x2xf32>
    %160 = tpu.matmul %159, %3, %cst_92 {dimension_numbers = #tpu.dot_dimension_numbers<[1], [0], [0], [1], [0, 0, 1, 1], [], []>} : vector<16x4xf32>, vector<4x2xf32>, vector<16x2xf32> -> vector<16x2xf32>
    %161 = arith.maximumf %158, %160 : vector<16x2xf32>
    %162 = arith.subf %158, %161 : vector<16x2xf32>
    %163 = math.exp %162 : vector<16x2xf32>
    %164 = arith.subf %160, %161 : vector<16x2xf32>
    %165 = math.exp %164 : vector<16x2xf32>
    %166 = arith.addf %163, %165 : vector<16x2xf32>
    %167 = tpu.reciprocal %166 {approx = true} : vector<16x2xf32> -> vector<16x2xf32>
    %cst_93 = arith.constant 0.000000e+00 : f32
    %168 = vector.broadcast %cst_93 : f32 to vector<16x4xf32>
    %169 = arith.mulf %163, %167 : vector<16x2xf32>
    %cst_94 = arith.constant dense<0.000000e+00> : vector<16x4xf32>
    %170 = tpu.matmul %169, %4, %cst_94 {dimension_numbers = #tpu.dot_dimension_numbers<[1], [0], [0], [1], [0, 0, 1, 1], [], []>} : vector<16x2xf32>, vector<2x4xf32>, vector<16x4xf32> -> vector<16x4xf32>
    %171 = arith.mulf %170, %135 : vector<16x4xf32>
    %172 = arith.addf %168, %171 : vector<16x4xf32>
    %173 = arith.mulf %165, %167 : vector<16x2xf32>
    %cst_95 = arith.constant dense<0.000000e+00> : vector<16x4xf32>
    %174 = tpu.matmul %173, %4, %cst_95 {dimension_numbers = #tpu.dot_dimension_numbers<[1], [0], [0], [1], [0, 0, 1, 1], [], []>} : vector<16x2xf32>, vector<2x4xf32>, vector<16x4xf32> -> vector<16x4xf32>
    %175 = arith.mulf %174, %136 : vector<16x4xf32>
    %176 = arith.addf %172, %175 : vector<16x4xf32>
    %177 = tpu.concatenate %156, %176 in 1 : vector<16x4xf32>, vector<16x4xf32> -> vector<16x8xf32>
    %cst_96 = arith.constant dense<0.000000e+00> : vector<16x8xf32>
    %178 = tpu.matmul %177, %113, %cst_96 {dimension_numbers = #tpu.dot_dimension_numbers<[1], [0], [0], [1], [0, 0, 1, 1], [], []>} : vector<16x8xf32>, vector<8x8xf32>, vector<16x8xf32> -> vector<16x8xf32>
    %179 = vector.broadcast %115 : vector<1x8xf32> to vector<16x8xf32>
    %180 = arith.addf %178, %179 : vector<16x8xf32>
    %181 = arith.addf %107, %180 : vector<16x8xf32>
    %cst_97 = arith.constant dense<0.000000e+00> : vector<16x8xf32>
    %182 = tpu.matmul %181, %5, %cst_97 {dimension_numbers = #tpu.dot_dimension_numbers<[1], [0], [0], [1], [0, 0, 1, 1], [], []>} : vector<16x8xf32>, vector<8x8xf32>, vector<16x8xf32> -> vector<16x8xf32>
    %183 = arith.subf %181, %182 : vector<16x8xf32>
    %184 = arith.mulf %183, %183 : vector<16x8xf32>
    %cst_98 = arith.constant dense<0.000000e+00> : vector<16x8xf32>
    %185 = tpu.matmul %184, %5, %cst_98 {dimension_numbers = #tpu.dot_dimension_numbers<[1], [0], [0], [1], [0, 0, 1, 1], [], []>} : vector<16x8xf32>, vector<8x8xf32>, vector<16x8xf32> -> vector<16x8xf32>
    %cst_99 = arith.constant 9.99999974E-6 : f32
    %186 = vector.broadcast %cst_99 : f32 to vector<16x8xf32>
    %187 = arith.addf %185, %186 : vector<16x8xf32>
    %188 = math.rsqrt %187 : vector<16x8xf32>
    %189 = arith.mulf %183, %188 : vector<16x8xf32>
    %190 = vector.broadcast %117 : vector<1x8xf32> to vector<16x8xf32>
    %191 = arith.mulf %189, %190 : vector<16x8xf32>
    %192 = vector.broadcast %119 : vector<1x8xf32> to vector<16x8xf32>
    %193 = arith.addf %191, %192 : vector<16x8xf32>
    %cst_100 = arith.constant dense<0.000000e+00> : vector<16x32xf32>
    %194 = tpu.matmul %193, %121, %cst_100 {dimension_numbers = #tpu.dot_dimension_numbers<[1], [0], [0], [1], [0, 0, 1, 1], [], []>} : vector<16x8xf32>, vector<8x32xf32>, vector<16x32xf32> -> vector<16x32xf32>
    %195 = vector.broadcast %123 : vector<1x32xf32> to vector<16x32xf32>
    %196 = arith.addf %194, %195 : vector<16x32xf32>
    %cst_101 = arith.constant 0.000000e+00 : f32
    %197 = vector.broadcast %cst_101 : f32 to vector<16x32xf32>
    %198 = arith.subf %197, %196 : vector<16x32xf32>
    %199 = math.exp %198 : vector<16x32xf32>
    %cst_102 = arith.constant 1.000000e+00 : f32
    %200 = vector.broadcast %cst_102 : f32 to vector<16x32xf32>
    %201 = arith.addf %200, %199 : vector<16x32xf32>
    %202 = tpu.reciprocal %201 {approx = true} : vector<16x32xf32> -> vector<16x32xf32>
    %203 = arith.mulf %196, %202 : vector<16x32xf32>
    %cst_103 = arith.constant dense<0.000000e+00> : vector<16x8xf32>
    %204 = tpu.matmul %203, %125, %cst_103 {dimension_numbers = #tpu.dot_dimension_numbers<[1], [0], [0], [1], [0, 0, 1, 1], [], []>} : vector<16x32xf32>, vector<32x8xf32>, vector<16x8xf32> -> vector<16x8xf32>
    %205 = vector.broadcast %127 : vector<1x8xf32> to vector<16x8xf32>
    %206 = arith.addf %204, %205 : vector<16x8xf32>
    %207 = arith.addf %181, %206 : vector<16x8xf32>
    %208 = arith.addf %207, %107 : vector<16x8xf32>
    %c0_104 = arith.constant 0 : index
    %c0_105 = arith.constant 0 : index
    %209 = vector.load %arg20[%c0_104, %c0_105] : memref<1x8xf32, #tpu.memory_space<vmem>>, vector<1x8xf32>
    %cst_106 = arith.constant dense<0.000000e+00> : vector<8xf32>
    %210 = vector.multi_reduction <add>, %208, %cst_106 [0] : vector<16x8xf32> to vector<8xf32>
    %211 = vector.shape_cast %210 : vector<8xf32> to vector<1x8xf32>
    %212 = arith.addf %209, %211 : vector<1x8xf32>
    %c0_107 = arith.constant 0 : index
    %c0_108 = arith.constant 0 : index
    %213 = vector.load %arg20[%c0_107, %c0_108] : memref<1x8xf32, #tpu.memory_space<vmem>>, vector<1x8xf32>
    tpu.vector_store %arg20[%c0_107, %c0_108], %212 {strides = array<i32>} : memref<1x8xf32, #tpu.memory_space<vmem>>, vector<1x8xf32>,
    %c0_i32_109 = arith.constant 0 : i32
    %214 = arith.cmpi eq, %arg0, %c0_i32_109 : i32
    %215 = arith.extui %214 : i1 to i32
    %c0_i32_110 = arith.constant 0 : i32
    %216 = arith.cmpi ne, %215, %c0_i32_110 : i32
    scf.if %216 {
      %c0_111 = arith.constant 0 : index
      %c0_112 = arith.constant 0 : index
      %217 = vector.load %arg20[%c0_111, %c0_112] : memref<1x8xf32, #tpu.memory_space<vmem>>, vector<1x8xf32>
      %cst_113 = arith.constant 6.250000e-02 : f32
      %218 = vector.broadcast %cst_113 : f32 to vector<1x8xf32>
      %219 = arith.mulf %217, %218 : vector<1x8xf32>
      %cst_114 = arith.constant dense<0.000000e+00> : vector<1x8xf32>
      %220 = tpu.matmul %219, %5, %cst_114 {dimension_numbers = #tpu.dot_dimension_numbers<[1], [0], [0], [1], [0, 0, 1, 1], [], []>} : vector<1x8xf32>, vector<8x8xf32>, vector<1x8xf32> -> vector<1x8xf32>
      %221 = arith.subf %219, %220 : vector<1x8xf32>
      %222 = arith.mulf %221, %221 : vector<1x8xf32>
      %cst_115 = arith.constant dense<0.000000e+00> : vector<1x8xf32>
      %223 = tpu.matmul %222, %5, %cst_115 {dimension_numbers = #tpu.dot_dimension_numbers<[1], [0], [0], [1], [0, 0, 1, 1], [], []>} : vector<1x8xf32>, vector<8x8xf32>, vector<1x8xf32> -> vector<1x8xf32>
      %cst_116 = arith.constant 9.99999974E-6 : f32
      %224 = vector.broadcast %cst_116 : f32 to vector<1x8xf32>
      %225 = arith.addf %223, %224 : vector<1x8xf32>
      %226 = math.rsqrt %225 : vector<1x8xf32>
      %227 = arith.mulf %221, %226 : vector<1x8xf32>
      %c0_117 = arith.constant 0 : index
      %c0_118 = arith.constant 0 : index
      %228 = vector.load %arg15[%c0_117, %c0_118] : memref<1x8xf32, #tpu.memory_space<vmem>>, vector<1x8xf32>
      %229 = arith.mulf %227, %228 : vector<1x8xf32>
      %c0_119 = arith.constant 0 : index
      %c0_120 = arith.constant 0 : index
      %230 = vector.load %arg16[%c0_119, %c0_120] : memref<1x8xf32, #tpu.memory_space<vmem>>, vector<1x8xf32>
      %231 = arith.addf %229, %230 : vector<1x8xf32>
      %c0_121 = arith.constant 0 : index
      %c0_122 = arith.constant 0 : index
      %232 = vector.load %arg17[%c0_121, %c0_122] : memref<8x20xf32, #tpu.memory_space<vmem>>, vector<8x20xf32>
      %cst_123 = arith.constant dense<0.000000e+00> : vector<1x20xf32>
      %233 = tpu.matmul %231, %232, %cst_123 {dimension_numbers = #tpu.dot_dimension_numbers<[1], [0], [0], [1], [0, 0, 1, 1], [], []>} : vector<1x8xf32>, vector<8x20xf32>, vector<1x20xf32> -> vector<1x20xf32>
      %c0_124 = arith.constant 0 : index
      %c0_125 = arith.constant 0 : index
      %234 = vector.load %arg18[%c0_124, %c0_125] : memref<1x20xf32, #tpu.memory_space<vmem>>, vector<1x20xf32>
      %235 = arith.addf %233, %234 : vector<1x20xf32>
      %c0_126 = arith.constant 0 : index
      %c0_127 = arith.constant 0 : index
      %236 = vector.load %arg19[%c0_126, %c0_127] : memref<1x20xf32, #tpu.memory_space<vmem>>, vector<1x20xf32>
      tpu.vector_store %arg19[%c0_126, %c0_127], %235 {strides = array<i32>} : memref<1x20xf32, #tpu.memory_space<vmem>>, vector<1x20xf32>,
    } else {
    }
    return
  }
  func.func @transform_0(%arg0: i32) -> (i32, i32) {
    %c0_i32 = arith.constant 0 : i32
    %c0_i32_0 = arith.constant 0 : i32
    return %arg0, %c0_i32 : i32, i32
  }
  func.func @transform_1(%arg0: i32) -> (i32, i32, i32) {
    %c0_i32 = arith.constant 0 : i32
    %c0_i32_0 = arith.constant 0 : i32
    %c0_i32_1 = arith.constant 0 : i32
    %c0_i32_2 = arith.constant 0 : i32
    return %c0_i32, %c0_i32_0, %c0_i32_1 : i32, i32, i32
  }
  func.func @transform_2(%arg0: i32) -> (i32, i32, i32) {
    %c0_i32 = arith.constant 0 : i32
    %c0_i32_0 = arith.constant 0 : i32
    %c0_i32_1 = arith.constant 0 : i32
    %c0_i32_2 = arith.constant 0 : i32
    return %c0_i32, %c0_i32_0, %c0_i32_1 : i32, i32, i32
  }
  func.func @transform_3(%arg0: i32) -> (i32, i32, i32) {
    %c0_i32 = arith.constant 0 : i32
    %c0_i32_0 = arith.constant 0 : i32
    %c0_i32_1 = arith.constant 0 : i32
    %c0_i32_2 = arith.constant 0 : i32
    return %c0_i32, %c0_i32_0, %c0_i32_1 : i32, i32, i32
  }
  func.func @transform_4(%arg0: i32) -> (i32, i32, i32) {
    %c0_i32 = arith.constant 0 : i32
    %c0_i32_0 = arith.constant 0 : i32
    %c0_i32_1 = arith.constant 0 : i32
    %c0_i32_2 = arith.constant 0 : i32
    return %c0_i32, %c0_i32_0, %c0_i32_1 : i32, i32, i32
  }
  func.func @transform_5(%arg0: i32) -> (i32, i32, i32) {
    %c0_i32 = arith.constant 0 : i32
    %c0_i32_0 = arith.constant 0 : i32
    %c0_i32_1 = arith.constant 0 : i32
    %c0_i32_2 = arith.constant 0 : i32
    return %c0_i32, %c0_i32_0, %c0_i32_1 : i32, i32, i32
  }
  func.func @transform_6(%arg0: i32) -> (i32, i32, i32) {
    %c0_i32 = arith.constant 0 : i32
    %c0_i32_0 = arith.constant 0 : i32
    %c0_i32_1 = arith.constant 0 : i32
    %c0_i32_2 = arith.constant 0 : i32
    return %c0_i32, %c0_i32_0, %c0_i32_1 : i32, i32, i32
  }
  func.func @transform_7(%arg0: i32) -> (i32, i32, i32) {
    %c0_i32 = arith.constant 0 : i32
    %c0_i32_0 = arith.constant 0 : i32
    %c0_i32_1 = arith.constant 0 : i32
    %c0_i32_2 = arith.constant 0 : i32
    return %c0_i32, %c0_i32_0, %c0_i32_1 : i32, i32, i32
  }
  func.func @transform_8(%arg0: i32) -> (i32, i32, i32) {
    %c0_i32 = arith.constant 0 : i32
    %c0_i32_0 = arith.constant 0 : i32
    %c0_i32_1 = arith.constant 0 : i32
    %c0_i32_2 = arith.constant 0 : i32
    return %c0_i32, %c0_i32_0, %c0_i32_1 : i32, i32, i32
  }
  func.func @transform_9(%arg0: i32) -> (i32, i32, i32) {
    %c0_i32 = arith.constant 0 : i32
    %c0_i32_0 = arith.constant 0 : i32
    %c0_i32_1 = arith.constant 0 : i32
    %c0_i32_2 = arith.constant 0 : i32
    return %c0_i32, %c0_i32_0, %c0_i32_1 : i32, i32, i32
  }
  func.func @transform_10(%arg0: i32) -> (i32, i32, i32) {
    %c0_i32 = arith.constant 0 : i32
    %c0_i32_0 = arith.constant 0 : i32
    %c0_i32_1 = arith.constant 0 : i32
    %c0_i32_2 = arith.constant 0 : i32
    return %c0_i32, %c0_i32_0, %c0_i32_1 : i32, i32, i32
  }
  func.func @transform_11(%arg0: i32) -> (i32, i32) {
    %c0_i32 = arith.constant 0 : i32
    %c0_i32_0 = arith.constant 0 : i32
    %c0_i32_1 = arith.constant 0 : i32
    return %c0_i32, %c0_i32_0 : i32, i32
  }
  func.func @transform_12(%arg0: i32) -> (i32, i32) {
    %c0_i32 = arith.constant 0 : i32
    %c0_i32_0 = arith.constant 0 : i32
    %c0_i32_1 = arith.constant 0 : i32
    return %c0_i32, %c0_i32_0 : i32, i32
  }
  func.func @transform_13(%arg0: i32) -> (i32, i32) {
    %c0_i32 = arith.constant 0 : i32
    %c0_i32_0 = arith.constant 0 : i32
    %c0_i32_1 = arith.constant 0 : i32
    return %c0_i32, %c0_i32_0 : i32, i32
  }
  func.func @transform_14(%arg0: i32) -> (i32, i32) {
    %c0_i32 = arith.constant 0 : i32
    %c0_i32_0 = arith.constant 0 : i32
    %c0_i32_1 = arith.constant 0 : i32
    return %c0_i32, %c0_i32_0 : i32, i32
  }
  func.func @transform_15(%arg0: i32) -> (i32, i32) {
    %c0_i32 = arith.constant 0 : i32
    %c0_i32_0 = arith.constant 0 : i32
    %c0_i32_1 = arith.constant 0 : i32
    return %c0_i32, %c0_i32_0 : i32, i32
  }
  func.func @transform_16(%arg0: i32) -> (i32, i32) {
    %c0_i32 = arith.constant 0 : i32
    %c0_i32_0 = arith.constant 0 : i32
    %c0_i32_1 = arith.constant 0 : i32
    return %c0_i32, %c0_i32_0 : i32, i32
  }
  func.func @transform_17(%arg0: i32) -> (i32, i32) {
    %c0_i32 = arith.constant 0 : i32
    %c0_i32_0 = arith.constant 0 : i32
    %c0_i32_1 = arith.constant 0 : i32
    return %c0_i32, %c0_i32_0 : i32, i32
  }
  func.func @transform_18(%arg0: i32) -> (i32, i32) {
    %c0_i32 = arith.constant 0 : i32
    %c0_i32_0 = arith.constant 0 : i32
    %c0_i32_1 = arith.constant 0 : i32
    return %c0_i32, %c0_i32_0 : i32, i32
  }
}

</mosaic_0001>

<bundles_post_ra>
// kernel: asl_interpreter_forward.4
= control target key start
LH: loop header
LB: loop body
LE: loop exit
PB: predicated region body
PF: predicated region fallthrough
CT: control target
= control target key end

     0   :  { %vm30_vm0 = vcmask 64512   ;;  %vm122_vm1 = vcmask 130048   ;;  %v283_v4 = vmov 0   ;;  %v284_v6 = vmov 0.0   ;;  %s377_s3 = inlined_call_operand.vmem [shape: f32[8,8], index: 3, kind: input, shape index: {}]   ;;  %s378_s1 = inlined_call_operand.vmem [shape: f32[16,8], index: 1, kind: input, shape index: {}, may-alias: {0,1}]   ;;  %s379_s2 = inlined_call_operand.vmem [shape: f32[16,16], index: 2, kind: input, shape index: {}]   ;;  %s380_s4 = inlined_call_operand.vmem [shape: f32[16,1], index: 4, kind: input, shape index: {}]   ;;  %s381_s5 = inlined_call_operand.vmem [shape: f32[1,8], index: 5, kind: input, shape index: {}]   ;;  %s382_s0 = inlined_call_operand.vmem [shape: f32[16,8], index: 0, kind: input, shape index: {}, may-alias: {0,1}]   ;;  %s383_s6 = inlined_call_operand.vmem [shape: f32[16,8], index: 6, kind: input, shape index: {}]   ;;  %s384_s7 = inlined_call_operand.vmem [shape: f32[16,8], index: 7, kind: output, shape index: {}]  }
   0x1   :  { %v35_v0 = vld [vmem:[%s377_s3] sm:$0xff]  ;;  %v34_v2 = vld [vmem:[%s378_s1 + $0x8] sm:$0xff]  ;;  %282 = vset.pattern.permute.xlu0 %v283_v4  ;;  %32 = vst.msk [vmem:[#allocation2 + $0x8] sm:$0xff] %vm30_vm0, %v284_v6  ;;  %31 = vst.msk [vmem:[#allocation2] sm:$0xff] %vm30_vm0, %v284_v6 }
   0x2   :  { %v33_v1 = vld [vmem:[%s378_s1] sm:$0xff]  ;;  %264 = vmatprep.subr.mxu0 %v35_v0  ;;  %v214_v7 = vld [vmem:[%s380_s4 + $0x8] sm:$0xff] }
   0x3   :  { %266 = vmatprep.mubr.msk.f32.mxu0 %vm30_vm0, %v33_v1  ;;  %265 = vmatpush3.msra.mxu0 %v35_v0  ;;  %v120_v3 = vld [vmem:[%s379_s2] sm:$0xff]  ;;  %v121_v11 = vld [vmem:[%s379_s2 + $0x8] sm:$0xff] }
   0x4   :  { %267 = vmatmul.mubr.msk.f32.vlgmr.msra.gmra.mrb[0].mxu0 %vm30_vm0, %v34_v2  ;;  %273 = vmatprep.mubr.msk.f32.mxu1 %vm122_vm1, %v120_v3  ;;  %v213_v5 = vld [vmem:[%s380_s4] sm:$0xff]  ;;  %v237_v24 = vld [vmem:[%s382_s0 + $0x8] sm:$0xff] }
   0x5   :  { %218 = vperm.xlu0 %282, %v213_v5   ;;  %v256_v19 = vld [vmem:[%s381_s5] ss:$0 sm:$0xff]  ;;  %v243_v30 = vld [vmem:[%s383_s6 + $0x8] sm:$0xff] }
   0x6   :  { %v236_v27 = vld [vmem:[%s382_s0] sm:$0xff] }
   0x7   :  { %v242_v32 = vld [vmem:[%s383_s6] sm:$0xff] }
   0x8   :  { %v119_v12 = vld [vmem:[#allocation2 + $0x8] sm:$0xff]  ;;  %v118_v13 = vld [vmem:[#allocation2] sm:$0xff] }
   0x9   :  { %223 = vperm.xlu0 %282, %v214_v7  }
  0x84   :  { %v219_v15 = vpop.permute.xlu0 %218 }
  0x85   :  { %v232_v22 = vmul.f32 %v256_v19, %v219_v15 }
  0x88   :  { %v224_v20 = vpop.permute.xlu0 %223 }
  0x89   :  { %v233_v21 = vmul.f32 %v256_v19, %v224_v20 }
  0xd7   :  { %v268_v8 = vpop.f32.mrb[0].mxu0 }
  0xd8   :  { %v109_v9 = vpop.f32.mrb[1].mxu0 }
  0xd9   :  { %v276_v10 = vpack.c.bf16 %v268_v8, %v109_v9 }
  0xdb   :  { %277 = vmatprep.subr.bf16.mxu1 %v276_v10 }
  0xdc   :  { %279 = vmatpush3.bf16.msra.mxu1 %v276_v10 }
  0xdf   :  { %274 = vmatmul.mubr.msk.f32.vlgmr.msra.gmra.mrb[0].mxu1 %vm122_vm1, %v121_v11 }
 0x1b2   :  { %v275_v14 = vpop.f32.mrb[0].mxu1 }
 0x1b3   :  { %v205_v16 = vadd.f32 %v275_v14, %v119_v12  ;;  %v195_v17 = vpop.f32.mrb[1].mxu1 }
 0x1b4   :  { %v204_v18 = vadd.f32 %v195_v17, %v118_v13 }
 0x1b5   :  { %207 = vst.msk [vmem:[#allocation2 + $0x8] sm:$0xff] %vm30_vm0, %v205_v16 }
 0x1b6   :  { %206 = vst.msk [vmem:[#allocation2] sm:$0xff] %vm30_vm0, %v204_v18 }
 0x1bc   :  { %v212_v23 = vld [vmem:[#allocation2 + $0x8] sm:$0xff] }
 0x1bd   :  { %v211_v25 = vld [vmem:[#allocation2] sm:$0xff]  ;;  %v235_v26 = vadd.f32 %v233_v21, %v212_v23 }
 0x1be   :  { %v234_v28 = vadd.f32 %v232_v22, %v211_v25 }
 0x1bf   :  { %v239_v29 = vadd.f32 %v237_v24, %v235_v26 }
 0x1c0   :  { %v238_v31 = vadd.f32 %v236_v27, %v234_v28 }
 0x1c1   :  { %v241_v33 = vmax.f32 %v239_v29, 0.0 }
 0x1c2   :  { %v240_v34 = vmax.f32 %v238_v31, 0.0 }
 0x1c3   :  { %v245_v35 = vadd.f32 %v243_v30, %v241_v33 }
 0x1c4   :  { %v244_v36 = vadd.f32 %v242_v32, %v240_v34 }
 0x1c5   :  { %247 = vst.msk [vmem:[%s384_s7 + $0x8] sm:$0xff] %vm30_vm0, %v245_v35 }
 0x1c6   :  { %246 = vst.msk [vmem:[%s384_s7] sm:$0xff] %vm30_vm0, %v244_v36 }

// kernel: asl_interpreter_forward.3
= control target key start
LH: loop header
LB: loop body
LE: loop exit
PB: predicated region body
PF: predicated region fallthrough
CT: control target
= control target key end

     0   :  { %vm27_vm0 = vcmask 64512   ;;  %vm119_vm1 = vcmask 130048   ;;  %v276_v4 = vmov 0   ;;  %v277_v6 = vmov 0.0   ;;  %s359_s3 = inlined_call_operand.vmem [shape: f32[8,8], index: 3, kind: input, shape index: {}]   ;;  %s360_s1 = inlined_call_operand.vmem [shape: f32[16,8], index: 1, kind: input, shape index: {}, may-alias: {0,1}]   ;;  %s361_s2 = inlined_call_operand.vmem [shape: f32[16,16], index: 2, kind: input, shape index: {}]   ;;  %s362_s4 = inlined_call_operand.vmem [shape: f32[16,1], index: 4, kind: input, shape index: {}]   ;;  %s363_s5 = inlined_call_operand.vmem [shape: f32[1,8], index: 5, kind: input, shape index: {}]   ;;  %s364_s0 = inlined_call_operand.vmem [shape: f32[16,8], index: 0, kind: input, shape index: {}, may-alias: {0,1}]   ;;  %s365_s6 = inlined_call_operand.vmem [shape: f32[16,8], index: 6, kind: output, shape index: {}]  }
   0x1   :  { %v32_v0 = vld [vmem:[%s359_s3] sm:$0xff]  ;;  %v31_v2 = vld [vmem:[%s360_s1 + $0x8] sm:$0xff]  ;;  %275 = vset.pattern.permute.xlu0 %v276_v4  ;;  %29 = vst.msk [vmem:[#allocation2 + $0x8] sm:$0xff] %vm27_vm0, %v277_v6  ;;  %28 = vst.msk [vmem:[#allocation2] sm:$0xff] %vm27_vm0, %v277_v6 }
   0x2   :  { %v30_v1 = vld [vmem:[%s360_s1] sm:$0xff]  ;;  %257 = vmatprep.subr.mxu0 %v32_v0  ;;  %v211_v7 = vld [vmem:[%s362_s4 + $0x8] sm:$0xff] }
   0x3   :  { %259 = vmatprep.mubr.msk.f32.mxu0 %vm27_vm0, %v30_v1  ;;  %258 = vmatpush3.msra.mxu0 %v32_v0  ;;  %v117_v3 = vld [vmem:[%s361_s2] sm:$0xff]  ;;  %v118_v11 = vld [vmem:[%s361_s2 + $0x8] sm:$0xff] }
   0x4   :  { %260 = vmatmul.mubr.msk.f32.vlgmr.msra.gmra.mrb[0].mxu0 %vm27_vm0, %v31_v2  ;;  %266 = vmatprep.mubr.msk.f32.mxu1 %vm119_vm1, %v117_v3  ;;  %v210_v5 = vld [vmem:[%s362_s4] sm:$0xff]  ;;  %v234_v24 = vld [vmem:[%s364_s0 + $0x8] sm:$0xff] }
   0x5   :  { %215 = vperm.xlu0 %275, %v210_v5   ;;  %v249_v19 = vld [vmem:[%s363_s5] ss:$0 sm:$0xff] }
   0x6   :  { %v233_v27 = vld [vmem:[%s364_s0] sm:$0xff] }
   0x8   :  { %v116_v12 = vld [vmem:[#allocation2 + $0x8] sm:$0xff]  ;;  %v115_v13 = vld [vmem:[#allocation2] sm:$0xff] }
   0x9   :  { %220 = vperm.xlu0 %275, %v211_v7  }
  0x84   :  { %v216_v15 = vpop.permute.xlu0 %215 }
  0x85   :  { %v229_v22 = vmul.f32 %v249_v19, %v216_v15 }
  0x88   :  { %v221_v20 = vpop.permute.xlu0 %220 }
  0x89   :  { %v230_v21 = vmul.f32 %v249_v19, %v221_v20 }
  0xd7   :  { %v261_v8 = vpop.f32.mrb[0].mxu0 }
  0xd8   :  { %v106_v9 = vpop.f32.mrb[1].mxu0 }
  0xd9   :  { %v269_v10 = vpack.c.bf16 %v261_v8, %v106_v9 }
  0xdb   :  { %270 = vmatprep.subr.bf16.mxu1 %v269_v10 }
  0xdc   :  { %272 = vmatpush3.bf16.msra.mxu1 %v269_v10 }
  0xdf   :  { %267 = vmatmul.mubr.msk.f32.vlgmr.msra.gmra.mrb[0].mxu1 %vm119_vm1, %v118_v11 }
 0x1b2   :  { %v268_v14 = vpop.f32.mrb[0].mxu1 }
 0x1b3   :  { %v202_v16 = vadd.f32 %v268_v14, %v116_v12  ;;  %v192_v17 = vpop.f32.mrb[1].mxu1 }
 0x1b4   :  { %v201_v18 = vadd.f32 %v192_v17, %v115_v13 }
 0x1b5   :  { %204 = vst.msk [vmem:[#allocation2 + $0x8] sm:$0xff] %vm27_vm0, %v202_v16 }
 0x1b6   :  { %203 = vst.msk [vmem:[#allocation2] sm:$0xff] %vm27_vm0, %v201_v18 }
 0x1bc   :  { %v209_v23 = vld [vmem:[#allocation2 + $0x8] sm:$0xff] }
 0x1bd   :  { %v208_v25 = vld [vmem:[#allocation2] sm:$0xff]  ;;  %v232_v26 = vadd.f32 %v230_v21, %v209_v23 }
 0x1be   :  { %v231_v28 = vadd.f32 %v229_v22, %v208_v25 }
 0x1bf   :  { %v236_v29 = vadd.f32 %v234_v24, %v232_v26 }
 0x1c0   :  { %v235_v30 = vadd.f32 %v233_v27, %v231_v28 }
 0x1c1   :  { %v238_v31 = vmax.f32 %v236_v29, 0.0 }
 0x1c2   :  { %v237_v32 = vmax.f32 %v235_v30, 0.0 }
 0x1c3   :  { %240 = vst.msk [vmem:[%s365_s6 + $0x8] sm:$0xff] %vm27_vm0, %v238_v31 }
 0x1c4   :  { %239 = vst.msk [vmem:[%s365_s6] sm:$0xff] %vm27_vm0, %v237_v32 }

// kernel: asl_interpreter_forward.5
= control target key start
LH: loop header
LB: loop body
LE: loop exit
PB: predicated region body
PF: predicated region fallthrough
CT: control target
= control target key end

     0   :  { %vm89_vm0 = vcmask 64512   ;;  %vm188_vm1 = vcmask 1043456   ;;  %s3461_s25 = smov 124   ;;  %s3462_s26 = smov 112   ;;  %vm181_vm2 = vcmask 31744   ;;  %vm383_vm3 = vcmask 1041408   ;;  %s3895_s1 = inlined_call_operand.vmem [shape: f32[2,8,24], index: 1, kind: input, shape index: {}]   ;;  %s3896_s0 = inlined_call_operand.vmem [shape: f32[16,8], index: 0, kind: input, shape index: {}]   ;;  %s3897_s11 = inlined_call_operand.vmem [shape: f32[4,2], index: 11, kind: input, shape index: {}]   ;;  %s3898_s2 = inlined_call_operand.vmem [shape: f32[2,1,24], index: 2, kind: input, shape index: {}]   ;;  %s3899_s12 = inlined_call_operand.vmem [shape: f32[2,4], index: 12, kind: input, shape index: {}]   ;;  %s3900_s3 = inlined_call_operand.vmem [shape: f32[2,8,8], index: 3, kind: input, shape index: {}]   ;;  %s3901_s13 = inlined_call_operand.vmem [shape: f32[8,8], index: 13, kind: input, shape index: {}]   ;;  %s3902_s4 = inlined_call_operand.vmem [shape: f32[2,1,8], index: 4, kind: input, shape index: {}]   ;;  %s3903_s7 = inlined_call_operand.vmem [shape: f32[2,8,32], index: 7, kind: input, shape index: {}]   ;;  %s3904_s5 = inlined_call_operand.vmem [shape: f32[2,1,8], index: 5, kind: input, shape index: {}]   ;;  %s3905_s6 = inlined_call_operand.vmem [shape: f32[2,1,8], index: 6, kind: input, shape index: {}]   ;;  %s3906_s9 = inlined_call_operand.vmem [shape: f32[2,32,8], index: 9, kind: input, shape index: {}]   ;;  %s3907_s8 = inlined_call_operand.vmem [shape: f32[2,1,32], index: 8, kind: input, shape index: {}]   ;;  %s3908_s10 = inlined_call_operand.vmem [shape: f32[2,1,8], index: 10, kind: input, shape index: {}]   ;;  %s3909_s16 = inlined_call_operand.vmem [shape: f32[8,20], index: 16, kind: input, shape index: {}]   ;;  %s3910_s14 = inlined_call_operand.vmem [shape: f32[1,8], index: 14, kind: input, shape index: {}]   ;;  %s3911_s15 = inlined_call_operand.vmem [shape: f32[1,8], index: 15, kind: input, shape index: {}]   ;;  %s3912_s17 = inlined_call_operand.vmem [shape: f32[1,20], index: 17, kind: input, shape index: {}]   ;;  %s3913_s18 = inlined_call_operand.vmem [shape: f32[1,20], index: 18, kind: output, shape index: {}]  }
   0x1   :  { %3916 = sst [smem:[#allocation3_spill]] %s3895_s1  ;;  %v2999_v4 = vld [vmem:[%s3898_s2] ss:$0 sm:$0xff]  ;;  %s3463_s27 = smov 8   ;;  %vm376_vm4 = vcmask 15360   ;;  %vm1323_vm5 = vcmask 261120  }
   0x2   :  { %3917 = sst [smem:[#allocation4_spill]] %s3896_s0  ;;  %s3919_s29 = sld [smem:[#allocation3_spill]]  ;;  %v3619_v21 = vld [vmem:[%s3899_s12] sm:$0x3]  ;;  %vm63_vm6 = vcmask 57344   ;;  %vm3469_vm7 = vmmov 0  }
   0x3   :  { %3918 = sst [smem:[#allocation5_spill]] %s3897_s11  ;;  %s3920_s19 = sld [smem:[#allocation4_spill]]  ;;  %vm2993_vm8 = vcmask 155648  }
   0x4   :  { %s3921_s11 = sld [smem:[#allocation5_spill]]  ;;  %s3464_s28 = smov 116  }
   0x5   :  { %s3465_s30 = smov 108   ;;  %s3466_s1 = smov 120  }
   0x6   :  { %s3467_s21 = smov 4  }
   0x8   :  { %v70_v0 = vld [vmem:[%s3919_s29] sm:$0xff] }
   0x9   :  { %v3571_v1 = vld [vmem:[%s3920_s19] sm:$0xff]  ;;  %v3576_v2 = vld [vmem:[%s3920_s19 + $0x8] sm:$0xff]  ;;  %3195 = vmatprep.subr.mxu0 %v70_v0 }
   0xa   :  { %3197 = vmatprep.mubr.msk.f32.mxu0 %vm89_vm0, %v3571_v1  ;;  %3196 = vmatpush3.msra.mxu0 %v70_v0  ;;  %v3585_v3 = vld [vmem:[%s3921_s11] sm:$0xf] }
   0xb   :  { %3198 = vmatmul.mubr.msk.f32.vlgmr.msra.gmra.mrb[0].mxu0 %vm89_vm0, %v3576_v2  ;;  %3200 = vmatprep.subr.msk.mxu1 %vm188_vm1, %v3585_v3 }
   0xc   :  { %3205 = vmatprep.subr.msk.mxu0 %vm188_vm1, %v3585_v3  ;;  %3201 = vmatpush3.msk.msra.mxu1 %vm188_vm1, %v3585_v3 }
   0xd   :  { %3206 = vmatpush3.msk.msra.mxu0 %vm188_vm1, %v3585_v3  ;;  %3210 = vmatprep.subr.msk.mxu1 %vm383_vm3, %v3619_v21 }
   0xe   :  { %3215 = vmatprep.subr.msk.mxu0 %vm383_vm3, %v3619_v21 }
  0xde   :  { %v3199_v5 = vpop.f32.mrb[0].mxu0 }
  0xdf   :  { %v168_v6 = vadd.f32 %v3199_v5, %v2999_v4  ;;  %v162_v7 = vpop.f32.mrb[1].mxu0 }
  0xe0   :  { %v163_v8 = vadd.f32 %v2999_v4, %v162_v7 }
  0xe1   :  { %175 = vrot.lane.b32.xlu1 %v168_v6, %s3461_s25 }
  0xe2   :  { %173 = vrot.lane.b32.xlu0 %v163_v8, %s3461_s25 }
  0xe5   :  { %269 = vrot.lane.b32.xlu1 %v168_v6, %s3462_s26 }
  0xe6   :  { %267 = vrot.lane.b32.xlu0 %v163_v8, %s3462_s26 }
  0xe9   :  { %567 = vrot.lane.b32.xlu1 %v168_v6, %s3463_s27 }
  0xea   :  { %565 = vrot.lane.b32.xlu0 %v163_v8, %s3463_s27 }
 0x153   :  { %v176_v9 = vpop.permute.xlu1 %175 }
 0x154   :  { %v174_v10 = vpop.permute.xlu0 %173  ;;  %v180_v12 = vmul.f32 %v176_v9, %v168_v6 }
 0x155   :  { %v179_v11 = vmul.f32 %v174_v10, %v163_v8 }
 0x157   :  { %v270_v13 = vpop.permute.xlu1 %269  ;;  %658 = vrot.lane.b32.xlu1 %v179_v11, %s3464_s28  ;;  %3202 = vmatprep.mubr.msk.f32.mxu1 %vm181_vm2, %v179_v11 }
 0x158   :  { %3203 = vmatmul.mubr.msk.f32.vlgmr.msra.gmra.mrb[0].mxu1 %vm181_vm2, %v180_v12  ;;  %v268_v14 = vpop.permute.xlu0 %267  ;;  %v274_v16 = vmul.f32 %v270_v13, %v168_v6 }
 0x159   :  { %v273_v15 = vmul.f32 %v268_v14, %v163_v8  ;;  %3211 = vmatpush3.msk.msra.mxu1 %vm383_vm3, %v3619_v21 }
 0x15a   :  { %3220 = vmatprep.subr.msk.mxu1 %vm188_vm1, %v3585_v3 }
 0x15b   :  { %660 = vrot.lane.b32.xlu1 %v180_v12, %s3464_s28  ;;  %3207 = vmatprep.mubr.msk.f32.mxu0 %vm181_vm2, %v273_v15  ;;  %v568_v19 = vpop.permute.xlu1 %567 }
 0x15c   :  { %3208 = vmatmul.mubr.msk.f32.vlgmr.msra.gmra.mrb[2].mxu0 %vm181_vm2, %v274_v16  ;;  %v566_v17 = vpop.permute.xlu0 %565  ;;  %v572_v20 = vmul.f32 %v568_v19, %v168_v6 }
 0x15d   :  { %v571_v18 = vmul.f32 %v566_v17, %v163_v8  ;;  %3216 = vmatpush3.msk.msra.mxu0 %vm383_vm3, %v3619_v21 }
 0x15e   :  { %3225 = vmatprep.subr.msk.mxu0 %vm188_vm1, %v3585_v3 }
 0x15f   :  { %555 = vrot.lane.b32.xlu1 %v163_v8, %s3465_s30  ;;  %575 = vrot.lane.b32.xlu0 %v571_v18, %s3464_s28 }
 0x163   :  { %557 = vrot.lane.b32.xlu1 %v168_v6, %s3465_s30  ;;  %577 = vrot.lane.b32.xlu0 %v572_v20, %s3464_s28 }
 0x167   :  { %462 = vrot.lane.b32.xlu0 %v163_v8, %s3466_s1 }
 0x16b   :  { %464 = vrot.lane.b32.xlu0 %v168_v6, %s3466_s1 }
 0x1c9   :  { %v659_v46 = vpop.permute.xlu1 %658 }
 0x1cd   :  { %v661_v50 = vpop.permute.xlu1 %660 }
 0x1d1   :  { %v576_v47 = vpop.permute.xlu0 %575  ;;  %v556_v52 = vpop.permute.xlu1 %555 }
 0x1d5   :  { %v578_v51 = vpop.permute.xlu0 %577  ;;  %v558_v54 = vpop.permute.xlu1 %557 }
 0x1d9   :  { %v463_v53 = vpop.permute.xlu0 %462 }
 0x1dd   :  { %v465_v55 = vpop.permute.xlu0 %464 }
 0x22b   :  { %v3204_v22 = vpop.f32.mrb[0].mxu1 }
 0x22c   :  { %v258_v23 = vpop.f32.mrb[1].mxu1 }
 0x22f   :  { %v3209_v24 = vpop.f32.mrb[2].mxu0 }
 0x230   :  { %v357_v25 = vmax.f32 %v3204_v22, %v3209_v24  ;;  %v347_v26 = vpop.f32.mrb[3].mxu0 }
 0x231   :  { %v356_v27 = vmax.f32 %v258_v23, %v347_v26 }
 0x232   :  { %v359_v28 = vsub.f32 %v3204_v22, %v357_v25  ;;  %v365_v29 = vsub.f32 %v3209_v24, %v357_v25 }
 0x233   :  { %v358_v30 = vsub.f32 %v258_v23, %v356_v27  ;;  %v364_v31 = vsub.f32 %v347_v26, %v356_v27 }
 0x234   :  { %v362_v32 = vmul.f32 1.442695, %v359_v28  ;;  %v368_v33 = vmul.f32 1.442695, %v365_v29 }
 0x235   :  { %v360_v34 = vmul.f32 1.442695, %v358_v30  ;;  %v366_v35 = vmul.f32 1.442695, %v364_v31 }
 0x236   :  { %3387 = vpow2.f32 %v362_v32  ;;  %v72_v32 = vld [vmem:[%s3900_s3] sm:$0xff] }
 0x237   :  { %3389 = vpow2.f32 %v368_v33 }
 0x238   :  { %3391 = vpow2.f32 %v360_v34 }
 0x239   :  { %3393 = vpow2.f32 %v366_v35 }
 0x240   :  { %v3388_v36 = vpop.eup %3387 }
 0x241   :  { %v3390_v37 = vpop.eup %3389 }
 0x242   :  { %v3392_v38 = vpop.eup %3391  ;;  %v371_v39 = vadd.f32 %v3390_v37, %v3388_v36 }
 0x243   :  { %v3394_v40 = vpop.eup %3393 }
 0x244   :  { %3395 = vrcp.f32 %v371_v39  ;;  %v370_v41 = vadd.f32 %v3394_v40, %v3392_v38 }
 0x246   :  { %3397 = vrcp.f32 %v370_v41 }
 0x24e   :  { %v3396_v42 = vpop.eup %3395 }
 0x24f   :  { %v375_v43 = vmul.f32 %v3396_v42, %v3388_v36  ;;  %v473_v44 = vmul.f32 %v3396_v42, %v3390_v37 }
 0x250   :  { %v3398_v45 = vpop.eup %3397 }
 0x251   :  { %v374_v48 = vmul.f32 %v3398_v45, %v3392_v38  ;;  %v472_v49 = vmul.f32 %v3398_v45, %v3394_v40 }
 0x253   :  { %3212 = vmatprep.mubr.msk.f32.mxu1 %vm376_vm4, %v374_v48  ;;  %3217 = vmatprep.mubr.msk.f32.mxu0 %vm376_vm4, %v472_v49  ;;  %v3026_v48 = vld [vmem:[%s3902_s4] ss:$0 sm:$0xff] }
 0x254   :  { %3213 = vmatmul.mubr.msk.f32.vlgmr.msra.gmra.mrb[2].mxu1 %vm376_vm4, %v375_v43  ;;  %3218 = vmatmul.mubr.msk.f32.vlgmr.msra.gmra.mrb[4].mxu0 %vm376_vm4, %v473_v44 }
 0x255   :  { %3221 = vmatpush3.msk.msra.mxu1 %vm188_vm1, %v3585_v3  ;;  %3226 = vmatpush3.msk.msra.mxu0 %vm188_vm1, %v3585_v3 }
 0x256   :  { %3222 = vmatprep.mubr.msk.f32.mxu1 %vm181_vm2, %v576_v47  ;;  %3227 = vmatprep.mubr.msk.f32.mxu0 %vm181_vm2, %v659_v46  ;;  %v3669_v47 = vld [vmem:[%s3901_s13] sm:$0xff] }
 0x257   :  { %3230 = vmatprep.subr.msk.mxu1 %vm383_vm3, %v3619_v21  ;;  %3235 = vmatprep.subr.msk.mxu0 %vm383_vm3, %v3619_v21 }
 0x258   :  { %3223 = vmatmul.mubr.msk.f32.vlgmr.msra.gmra.mrb[4].mxu1 %vm181_vm2, %v578_v51  ;;  %3228 = vmatmul.mubr.msk.f32.vlgmr.msra.gmra.mrb[6].mxu0 %vm181_vm2, %v661_v50 }
 0x259   :  { %3231 = vmatpush3.msk.msra.mxu1 %vm383_vm3, %v3619_v21  ;;  %3236 = vmatpush3.msk.msra.mxu0 %vm383_vm3, %v3619_v21 }
 0x25a   :  { %3240 = vmatprep.subr.mxu1 %v72_v32  ;;  %3245 = vmatprep.subr.mxu0 %v3669_v47 }
 0x327   :  { %v3214_v56 = vpop.f32.mrb[2].mxu1  ;;  %v3219_v57 = vpop.f32.mrb[4].mxu0 }
 0x328   :  { %v469_v58 = vmul.f32 %v3214_v56, %v465_v55  ;;  %v562_v59 = vmul.f32 %v3219_v57, %v558_v54  ;;  %v453_v60 = vpop.f32.mrb[3].mxu1  ;;  %v546_v61 = vpop.f32.mrb[5].mxu0 }
 0x329   :  { %v468_v62 = vmul.f32 %v463_v53, %v453_v60  ;;  %v561_v63 = vmul.f32 %v556_v52, %v546_v61  ;;  %v76_v61 = vld [vmem:[%s3903_s7] sm:$0xff] }
 0x32a   :  { %v564_v0 = vadd.f32 %v562_v59, %v469_v58 }
 0x32b   :  { %v563_v4 = vadd.f32 %v561_v63, %v468_v62  ;;  %v3224_v5 = vpop.f32.mrb[4].mxu1  ;;  %v3229_v6 = vpop.f32.mrb[6].mxu0 }
 0x32c   :  { %v742_v7 = vmax.f32 %v3224_v5, %v3229_v6  ;;  %v649_v8 = vpop.f32.mrb[5].mxu1  ;;  %v732_v9 = vpop.f32.mrb[7].mxu0 }
 0x32d   :  { %v741_v10 = vmax.f32 %v649_v8, %v732_v9 }
 0x32e   :  { %v744_v11 = vsub.f32 %v3224_v5, %v742_v7  ;;  %v750_v12 = vsub.f32 %v3229_v6, %v742_v7  ;;  %v3033_v6 = vld [vmem:[%s3904_s5] ss:$0 sm:$0xff] }
 0x32f   :  { %v743_v13 = vsub.f32 %v649_v8, %v741_v10  ;;  %v749_v14 = vsub.f32 %v732_v9, %v741_v10  ;;  %v3034_v10 = vld [vmem:[%s3905_s6] ss:$0 sm:$0xff] }
 0x330   :  { %v747_v15 = vmul.f32 1.442695, %v744_v11  ;;  %v753_v16 = vmul.f32 1.442695, %v750_v12 }
 0x331   :  { %v745_v17 = vmul.f32 1.442695, %v743_v13  ;;  %v751_v18 = vmul.f32 1.442695, %v749_v14 }
 0x332   :  { %3399 = vpow2.f32 %v747_v15  ;;  %v78_v15 = vld [vmem:[%s3906_s9] sm:$0xff] }
 0x333   :  { %3401 = vpow2.f32 %v753_v16  ;;  %v79_v16 = vld [vmem:[%s3906_s9 + $0x8] sm:$0xff] }
 0x334   :  { %3403 = vpow2.f32 %v745_v17  ;;  %v3362_v17 = vpack.c.bf16 %v79_v16, %v78_v15 }
 0x335   :  { %3405 = vpow2.f32 %v751_v18  ;;  %v80_v18 = vld [vmem:[%s3906_s9 + $0x10] sm:$0xff] }
 0x33c   :  { %v3400_v19 = vpop.eup %3399 }
 0x33d   :  { %v3402_v20 = vpop.eup %3401 }
 0x33e   :  { %v3404_v22 = vpop.eup %3403  ;;  %v756_v23 = vadd.f32 %v3402_v20, %v3400_v19 }
 0x33f   :  { %v3406_v24 = vpop.eup %3405 }
 0x340   :  { %3407 = vrcp.f32 %v756_v23  ;;  %v755_v25 = vadd.f32 %v3406_v24, %v3404_v22 }
 0x342   :  { %3409 = vrcp.f32 %v755_v25 }
 0x34a   :  { %v3408_v26 = vpop.eup %3407 }
 0x34b   :  { %v760_v27 = vmul.f32 %v3408_v26, %v3400_v19  ;;  %v847_v28 = vmul.f32 %v3408_v26, %v3402_v20  ;;  %v81_v19 = vld [vmem:[%s3906_s9 + $0x18] sm:$0xff] }
 0x34c   :  { %v3410_v29 = vpop.eup %3409  ;;  %v3366_v20 = vpack.c.bf16 %v81_v19, %v80_v18 }
 0x34d   :  { %v759_v30 = vmul.f32 %v3410_v29, %v3404_v22  ;;  %v846_v31 = vmul.f32 %v3410_v29, %v3406_v24  ;;  %v3035_v22 = vld [vmem:[%s3907_s8] ss:$0 sm:$0xff] }
 0x34f   :  { %3232 = vmatprep.mubr.msk.f32.mxu1 %vm376_vm4, %v759_v30  ;;  %3237 = vmatprep.mubr.msk.f32.mxu0 %vm376_vm4, %v846_v31 }
 0x350   :  { %3233 = vmatmul.mubr.msk.f32.vlgmr.msra.gmra.mrb[6].mxu1 %vm376_vm4, %v760_v27  ;;  %3238 = vmatmul.mubr.msk.f32.vlgmr.msra.gmra.mrb[8].mxu0 %vm376_vm4, %v847_v28 }
 0x351   :  { %3241 = vmatpush3.msra.mxu1 %v72_v32  ;;  %3246 = vmatpush3.msra.mxu0 %v3669_v47 }
 0x352   :  { %3250 = vmatprep.subr.mxu1 %v3669_v47  ;;  %3255 = vmatprep.subr.mxu0 %v76_v61 }
 0x423   :  { %v3234_v33 = vpop.f32.mrb[6].mxu1  ;;  %v3239_v34 = vpop.f32.mrb[8].mxu0 }
 0x424   :  { %v843_v35 = vmul.f32 %v3234_v33, %v465_v55  ;;  %v930_v36 = vmul.f32 %v3239_v34, %v558_v54  ;;  %v833_v37 = vpop.f32.mrb[7].mxu1  ;;  %v920_v38 = vpop.f32.mrb[9].mxu0 }
 0x425   :  { %v842_v39 = vmul.f32 %v833_v37, %v463_v53  ;;  %v929_v40 = vmul.f32 %v920_v38, %v556_v52 }
 0x426   :  { %v932_v41 = vadd.f32 %v930_v36, %v843_v35 }
 0x427   :  { %v931_v42 = vadd.f32 %v929_v40, %v842_v39  ;;  %v3041_v39 = vld [vmem:[%s3919_s29 + $0x8] sm:$0xff]  ;;  %v3038_v40 = vld [vmem:[%s3908_s10] ss:$0 sm:$0xff] }
 0x428   :  { %937 = vrot.lane.b32.xlu1 %v932_v41, %s3467_s21 }
 0x429   :  { %935 = vrot.lane.b32.xlu0 %v931_v42, %s3467_s21 }
 0x49a   :  { %v938_v43 = vpop.permute.xlu1 %937 }
 0x49b   :  { %v936_v44 = vpop.permute.xlu0 %935  ;;  %v942_v46 = vsel %vm181_vm2, %v564_v0, %v938_v43 }
 0x49c   :  { %v941_v45 = vsel %vm181_vm2, %v563_v4, %v936_v44 }
 0x49d   :  { %3242 = vmatprep.mubr.msk.f32.mxu1 %vm89_vm0, %v941_v45 }
 0x49e   :  { %3243 = vmatmul.mubr.msk.f32.vlgmr.msra.gmra.mrb[8].mxu1 %vm89_vm0, %v942_v46 }
 0x49f   :  { %3251 = vmatpush3.msra.mxu1 %v3669_v47 }
 0x4a0   :  { %3363 = vmatprep.subr.bf16.mxu1 %v3362_v17 }
 0x571   :  { %v3244_v49 = vpop.f32.mrb[8].mxu1 }
 0x572   :  { %v1027_v50 = vadd.f32 %v3244_v49, %v3026_v48  ;;  %v1021_v51 = vpop.f32.mrb[9].mxu1 }
 0x573   :  { %v1022_v52 = vadd.f32 %v3026_v48, %v1021_v51 }
 0x574   :  { %v3682_v54 = vadd.f32 %v1027_v50, %v3576_v2 }
 0x575   :  { %v3679_v53 = vadd.f32 %v1022_v52, %v3571_v1 }
 0x577   :  { %3247 = vmatprep.mubr.msk.f32.mxu0 %vm89_vm0, %v3679_v53 }
 0x578   :  { %3248 = vmatmul.mubr.msk.f32.vlgmr.msra.gmra.mrb[10].mxu0 %vm89_vm0, %v3682_v54 }
 0x579   :  { %3256 = vmatpush3.msra.mxu0 %v76_v61 }
 0x57a   :  { %3271 = vmatprep.subr.mxu0 %v3041_v39 }
 0x64b   :  { %v3249_v55 = vpop.f32.mrb[10].mxu0 }
 0x64c   :  { %v1114_v56 = vsub.f32 %v3682_v54, %v3249_v55  ;;  %v1104_v57 = vpop.f32.mrb[11].mxu0 }
 0x64d   :  { %v1113_v58 = vsub.f32 %v3679_v53, %v1104_v57 }
 0x64e   :  { %v1116_v60 = vmul.f32 %v1114_v56, %v1114_v56 }
 0x64f   :  { %v1115_v59 = vmul.f32 %v1113_v58, %v1113_v58 }
 0x651   :  { %3252 = vmatprep.mubr.msk.f32.mxu1 %vm89_vm0, %v1115_v59 }
 0x652   :  { %3253 = vmatmul.mubr.msk.f32.vlgmr.msra.gmra.mrb[10].mxu1 %vm89_vm0, %v1116_v60 }
 0x653   :  { %3365 = vmatpush3.bf16.msra.mxu1 %v3362_v17 }
 0x654   :  { %3367 = vmatprep.subr.bf16.mxu1 %v3366_v20 }
 0x657   :  { %3369 = vmatpush3.bf16.msra.mxu1 %v3366_v20 }
 0x658   :  { %3281 = vmatprep.subr.msk.mxu1 %vm188_vm1, %v3585_v3 }
 0x725   :  { %v3254_v62 = vpop.f32.mrb[10].mxu1 }
 0x726   :  { %v1195_v63 = vadd.f32 1e-05, %v3254_v62  ;;  %v1189_v0 = vpop.f32.mrb[11].mxu1 }
 0x727   :  { %v1190_v4 = vadd.f32 1e-05, %v1189_v0 }
 0x728   :  { %3411 = vrsqrt.f32 %v1195_v63 }
 0x729   :  { %3413 = vrsqrt.f32 %v1190_v4 }
 0x732   :  { %v3412_v5 = vpop.eup %3411 }
 0x733   :  { %v3414_v7 = vpop.eup %3413  ;;  %v1201_v8 = vmul.f32 %v3412_v5, %v1114_v56 }
 0x734   :  { %v1200_v9 = vmul.f32 %v3414_v7, %v1113_v58 }
 0x735   :  { %v1209_v11 = vmul.f32 %v3033_v6, %v1201_v8 }
 0x736   :  { %v1208_v12 = vmul.f32 %v3033_v6, %v1200_v9 }
 0x737   :  { %v1217_v14 = vadd.f32 %v3034_v10, %v1209_v11 }
 0x738   :  { %v1216_v13 = vadd.f32 %v3034_v10, %v1208_v12 }
 0x73a   :  { %3257 = vmatprep.mubr.msk.f32.mxu0 %vm89_vm0, %v1216_v13 }
 0x73b   :  { %3258 = vmatmul.mubr.msk.f32.vlgmr.msra.gmra.mrb[12].mxu0 %vm89_vm0, %v1217_v14 }
 0x73c   :  { %3272 = vmatpush3.msra.mxu0 %v3041_v39 }
 0x73d   :  { %3276 = vmatprep.subr.msk.mxu0 %vm188_vm1, %v3585_v3 }
 0x80e   :  { %v3259_v23 = vpop.f32.mrb[12].mxu0 }
 0x80f   :  { %v1302_v24 = vadd.f32 %v3259_v23, %v3035_v22  ;;  %v1296_v25 = vpop.f32.mrb[13].mxu0 }
 0x810   :  { %v1297_v26 = vadd.f32 %v3035_v22, %v1296_v25 }
 0x811   :  { %v1306_v27 = vsub.f32 0.0, %v1302_v24 }
 0x812   :  { %v1305_v28 = vsub.f32 0.0, %v1297_v26 }
 0x813   :  { %v1309_v29 = vmul.f32 1.442695, %v1306_v27 }
 0x814   :  { %v1307_v30 = vmul.f32 1.442695, %v1305_v28 }
 0x815   :  { %3415 = vpow2.f32 %v1309_v29 }
 0x816   :  { %3417 = vpow2.f32 %v1307_v30 }
 0x81f   :  { %v3416_v31 = vpop.eup %3415 }
 0x820   :  { %v3418_v32 = vpop.eup %3417  ;;  %v1312_v33 = vadd.f32 1.0, %v3416_v31 }
 0x821   :  { %v1311_v34 = vadd.f32 1.0, %v3418_v32 }
 0x822   :  { %3419 = vrcp.f32 %v1312_v33 }
 0x823   :  { %3421 = vrcp.f32 %v1311_v34 }
 0x82c   :  { %v3420_v35 = vpop.eup %3419 }
 0x82d   :  { %v3422_v36 = vpop.eup %3421  ;;  %v1316_v38 = vmul.f32 %v3420_v35, %v1302_v24 }
 0x82e   :  { %v1315_v37 = vmul.f32 %v3422_v36, %v1297_v26 }
 0x830   :  { %3268 = vmatprep.mubr.msk.f32.mxu1 %vm1323_vm5, %v1315_v37 }
 0x831   :  { %3269 = vmatmul.mubr.msk.f32.vlgmr.msra.gmra.mrb[12].mxu1 %vm1323_vm5, %v1316_v38 }
 0x832   :  { %3282 = vmatpush3.msk.msra.mxu1 %vm188_vm1, %v3585_v3 }
 0x833   :  { %3291 = vmatprep.subr.msk.mxu1 %vm383_vm3, %v3619_v21 }
 0x904   :  { %v3270_v41 = vpop.f32.mrb[12].mxu1 }
 0x905   :  { %v1402_v42 = vadd.f32 %v3270_v41, %v3038_v40  ;;  %v1396_v43 = vpop.f32.mrb[13].mxu1 }
 0x906   :  { %v1397_v44 = vadd.f32 %v3038_v40, %v1396_v43 }
 0x907   :  { %v1406_v45 = vadd.f32 %v1402_v42, %v3682_v54 }
 0x908   :  { %v1405_v46 = vadd.f32 %v1397_v44, %v3679_v53 }
 0x909   :  { %v3740_v49 = vadd.f32 %v1406_v45, %v3576_v2 }
 0x90a   :  { %v3737_v48 = vadd.f32 %v1405_v46, %v3571_v1  ;;  %v3054_v1 = vld [vmem:[%s3898_s2 + $0x1] ss:$0 sm:$0xff] }
 0x90c   :  { %3273 = vmatprep.mubr.msk.f32.mxu0 %vm89_vm0, %v3737_v48 }
 0x90d   :  { %3274 = vmatmul.mubr.msk.f32.vlgmr.msra.gmra.mrb[14].mxu0 %vm89_vm0, %v3740_v49 }
 0x90e   :  { %3277 = vmatpush3.msk.msra.mxu0 %vm188_vm1, %v3585_v3 }
 0x90f   :  { %3286 = vmatprep.subr.msk.mxu0 %vm383_vm3, %v3619_v21 }
 0x9e0   :  { %v3275_v50 = vpop.f32.mrb[14].mxu0 }
 0x9e1   :  { %v1510_v51 = vpop.f32.mrb[15].mxu0  ;;  %v1516_v52 = vadd.f32 %v3275_v50, %v3054_v1 }
 0x9e2   :  { %v1511_v2 = vadd.f32 %v3054_v1, %v1510_v51 }
 0x9e4   :  { %1610 = vrot.lane.b32.xlu1 %v1511_v2, %s3462_s26  ;;  %1521 = vrot.lane.b32.xlu0 %v1511_v2, %s3461_s25 }
 0x9e8   :  { %1612 = vrot.lane.b32.xlu1 %v1516_v52, %s3462_s26  ;;  %1523 = vrot.lane.b32.xlu0 %v1516_v52, %s3461_s25 }
 0x9ec   :  { %1905 = vrot.lane.b32.xlu1 %v1516_v52, %s3463_s27  ;;  %1903 = vrot.lane.b32.xlu0 %v1511_v2, %s3463_s27 }
 0xa56   :  { %v1611_v53 = vpop.permute.xlu1 %1610  ;;  %v1522_v54 = vpop.permute.xlu0 %1521 }
 0xa57   :  { %v1616_v55 = vmul.f32 %v1611_v53, %v1511_v2  ;;  %v1527_v56 = vmul.f32 %v1522_v54, %v1511_v2 }
 0xa59   :  { %3283 = vmatprep.mubr.msk.f32.mxu1 %vm181_vm2, %v1616_v55  ;;  %1996 = vrot.lane.b32.xlu1 %v1527_v56, %s3464_s28 }
 0xa5a   :  { %3278 = vmatprep.mubr.msk.f32.mxu0 %vm181_vm2, %v1527_v56  ;;  %v1613_v57 = vpop.permute.xlu1 %1612  ;;  %v1524_v58 = vpop.permute.xlu0 %1523 }
 0xa5b   :  { %v1617_v59 = vmul.f32 %v1613_v57, %v1516_v52  ;;  %v1528_v60 = vmul.f32 %v1524_v58, %v1516_v52 }
 0xa5d   :  { %3284 = vmatmul.mubr.msk.f32.vlgmr.msra.gmra.mrb[14].mxu1 %vm181_vm2, %v1617_v59  ;;  %1998 = vrot.lane.b32.xlu1 %v1528_v60, %s3464_s28 }
 0xa5e   :  { %3279 = vmatmul.mubr.msk.f32.vlgmr.msra.gmra.mrb[16].mxu0 %vm181_vm2, %v1528_v60  ;;  %v1904_v61 = vpop.permute.xlu0 %1903  ;;  %3292 = vmatpush3.msk.msra.mxu1 %vm383_vm3, %v3619_v21  ;;  %v1906_v63 = vpop.permute.xlu1 %1905 }
 0xa5f   :  { %v1909_v62 = vmul.f32 %v1904_v61, %v1511_v2  ;;  %3287 = vmatpush3.msk.msra.mxu0 %vm383_vm3, %v3619_v21  ;;  %3301 = vmatprep.subr.msk.mxu1 %vm188_vm1, %v3585_v3  ;;  %v1910_v0 = vmul.f32 %v1906_v63, %v1516_v52 }
 0xa60   :  { %3296 = vmatprep.subr.msk.mxu0 %vm188_vm1, %v3585_v3 }
 0xa61   :  { %1893 = vrot.lane.b32.xlu1 %v1511_v2, %s3465_s30  ;;  %1913 = vrot.lane.b32.xlu0 %v1909_v62, %s3464_s28 }
 0xa65   :  { %1895 = vrot.lane.b32.xlu1 %v1516_v52, %s3465_s30  ;;  %1915 = vrot.lane.b32.xlu0 %v1910_v0, %s3464_s28 }
 0xa69   :  { %1800 = vrot.lane.b32.xlu0 %v1511_v2, %s3466_s1 }
 0xa6d   :  { %1802 = vrot.lane.b32.xlu0 %v1516_v52, %s3466_s1 }
 0xacb   :  { %v1997_v29 = vpop.permute.xlu1 %1996 }
 0xacf   :  { %v1999_v33 = vpop.permute.xlu1 %1998 }
 0xad3   :  { %v1914_v30 = vpop.permute.xlu0 %1913 }
 0xad7   :  { %v1916_v34 = vpop.permute.xlu0 %1915 }
 0xadb   :  { %v1801_v35 = vpop.permute.xlu0 %1800 }
 0xadf   :  { %v1803_v37 = vpop.permute.xlu0 %1802 }
 0xb30   :  { %v3285_v4 = vpop.f32.mrb[14].mxu1 }
 0xb31   :  { %v3280_v5 = vpop.f32.mrb[16].mxu0  ;;  %v1690_v6 = vpop.f32.mrb[15].mxu1 }
 0xb32   :  { %v1700_v7 = vmax.f32 %v3280_v5, %v3285_v4  ;;  %v1601_v8 = vpop.f32.mrb[17].mxu0 }
 0xb33   :  { %v1699_v9 = vmax.f32 %v1601_v8, %v1690_v6 }
 0xb34   :  { %v1702_v10 = vsub.f32 %v3280_v5, %v1700_v7  ;;  %v1708_v11 = vsub.f32 %v3285_v4, %v1700_v7 }
 0xb35   :  { %v1701_v12 = vsub.f32 %v1601_v8, %v1699_v9  ;;  %v1707_v13 = vsub.f32 %v1690_v6, %v1699_v9 }
 0xb36   :  { %v1705_v14 = vmul.f32 1.442695, %v1702_v10  ;;  %v1711_v15 = vmul.f32 1.442695, %v1708_v11 }
 0xb37   :  { %v1703_v16 = vmul.f32 1.442695, %v1701_v12  ;;  %v1709_v17 = vmul.f32 1.442695, %v1707_v13  ;;  %v3043_v13 = vld [vmem:[%s3900_s3 + $0x8] sm:$0xff] }
 0xb38   :  { %3423 = vpow2.f32 %v1705_v14 }
 0xb39   :  { %3425 = vpow2.f32 %v1711_v15 }
 0xb3a   :  { %3427 = vpow2.f32 %v1703_v16 }
 0xb3b   :  { %3429 = vpow2.f32 %v1709_v17 }
 0xb42   :  { %v3424_v18 = vpop.eup %3423 }
 0xb43   :  { %v3426_v19 = vpop.eup %3425 }
 0xb44   :  { %v3428_v20 = vpop.eup %3427  ;;  %v1714_v22 = vadd.f32 %v3426_v19, %v3424_v18 }
 0xb45   :  { %v3430_v23 = vpop.eup %3429 }
 0xb46   :  { %3431 = vrcp.f32 %v1714_v22  ;;  %v1713_v24 = vadd.f32 %v3430_v23, %v3428_v20 }
 0xb48   :  { %3433 = vrcp.f32 %v1713_v24 }
 0xb50   :  { %v3432_v25 = vpop.eup %3431 }
 0xb51   :  { %v1718_v26 = vmul.f32 %v3432_v25, %v3424_v18  ;;  %v1811_v27 = vmul.f32 %v3432_v25, %v3426_v19 }
 0xb52   :  { %v3434_v28 = vpop.eup %3433 }
 0xb53   :  { %v1717_v31 = vmul.f32 %v3434_v28, %v3428_v20  ;;  %v1810_v32 = vmul.f32 %v3434_v28, %v3430_v23 }
 0xb55   :  { %3288 = vmatprep.mubr.msk.f32.mxu0 %vm376_vm4, %v1717_v31  ;;  %3293 = vmatprep.mubr.msk.f32.mxu1 %vm376_vm4, %v1810_v32 }
 0xb56   :  { %3289 = vmatmul.mubr.msk.f32.vlgmr.msra.gmra.mrb[18].mxu0 %vm376_vm4, %v1718_v26  ;;  %3294 = vmatmul.mubr.msk.f32.vlgmr.msra.gmra.mrb[16].mxu1 %vm376_vm4, %v1811_v27 }
 0xb57   :  { %3297 = vmatpush3.msk.msra.mxu0 %vm188_vm1, %v3585_v3  ;;  %3302 = vmatpush3.msk.msra.mxu1 %vm188_vm1, %v3585_v3  ;;  %v1894_v3 = vpop.permute.xlu1 %1893 }
 0xb58   :  { %3298 = vmatprep.mubr.msk.f32.mxu0 %vm181_vm2, %v1914_v30  ;;  %3303 = vmatprep.mubr.msk.f32.mxu1 %vm181_vm2, %v1997_v29  ;;  %v3081_v29 = vld [vmem:[%s3902_s4 + $0x1] ss:$0 sm:$0xff] }
 0xb59   :  { %3306 = vmatprep.subr.msk.mxu0 %vm383_vm3, %v3619_v21  ;;  %3311 = vmatprep.subr.msk.mxu1 %vm383_vm3, %v3619_v21 }
 0xb5a   :  { %3299 = vmatmul.mubr.msk.f32.vlgmr.msra.gmra.mrb[20].mxu0 %vm181_vm2, %v1916_v34  ;;  %3304 = vmatmul.mubr.msk.f32.vlgmr.msra.gmra.mrb[18].mxu1 %vm181_vm2, %v1999_v33 }
 0xb5b   :  { %3307 = vmatpush3.msk.msra.mxu0 %vm383_vm3, %v3619_v21  ;;  %3312 = vmatpush3.msk.msra.mxu1 %vm383_vm3, %v3619_v21  ;;  %v1896_v36 = vpop.permute.xlu1 %1895 }
 0xb5c   :  { %3321 = vmatprep.subr.mxu1 %v3669_v47  ;;  %3316 = vmatprep.subr.mxu0 %v3043_v13 }
 0xc29   :  { %v3290_v38 = vpop.f32.mrb[18].mxu0  ;;  %v3295_v39 = vpop.f32.mrb[16].mxu1 }
 0xc2a   :  { %v1807_v40 = vmul.f32 %v3290_v38, %v1803_v37  ;;  %v1900_v41 = vmul.f32 %v3295_v39, %v1896_v36  ;;  %v1791_v42 = vpop.f32.mrb[19].mxu0  ;;  %v1884_v43 = vpop.f32.mrb[17].mxu1 }
 0xc2b   :  { %v1806_v44 = vmul.f32 %v1801_v35, %v1791_v42  ;;  %v1899_v45 = vmul.f32 %v1894_v3, %v1884_v43 }
 0xc2c   :  { %v1902_v46 = vadd.f32 %v1900_v41, %v1807_v40  ;;  %v3047_v41 = vld [vmem:[%s3903_s7 + $0x8] sm:$0xff] }
 0xc2d   :  { %v1901_v1 = vadd.f32 %v1899_v45, %v1806_v44  ;;  %v3300_v50 = vpop.f32.mrb[20].mxu0  ;;  %v3305_v51 = vpop.f32.mrb[18].mxu1 }
 0xc2e   :  { %v2080_v2 = vmax.f32 %v3300_v50, %v3305_v51  ;;  %v1987_v21 = vpop.f32.mrb[21].mxu0  ;;  %v2070_v52 = vpop.f32.mrb[19].mxu1 }
 0xc2f   :  { %v2079_v53 = vmax.f32 %v1987_v21, %v2070_v52 }
 0xc30   :  { %v2082_v54 = vsub.f32 %v3300_v50, %v2080_v2  ;;  %v2088_v55 = vsub.f32 %v3305_v51, %v2080_v2 }
 0xc31   :  { %v2081_v56 = vsub.f32 %v1987_v21, %v2079_v53  ;;  %v2087_v57 = vsub.f32 %v2070_v52, %v2079_v53  ;;  %v3089_v21 = vld [vmem:[%s3905_s6 + $0x1] ss:$0 sm:$0xff] }
 0xc32   :  { %v2085_v58 = vmul.f32 1.442695, %v2082_v54  ;;  %v2091_v59 = vmul.f32 1.442695, %v2088_v55 }
 0xc33   :  { %v2083_v60 = vmul.f32 1.442695, %v2081_v56  ;;  %v2089_v61 = vmul.f32 1.442695, %v2087_v57  ;;  %v3049_v56 = vld [vmem:[%s3906_s9 + $0x20] sm:$0xff]  ;;  %v3050_v57 = vld [vmem:[%s3906_s9 + $0x28] sm:$0xff] }
 0xc34   :  { %3435 = vpow2.f32 %v2085_v58  ;;  %v3370_v58 = vpack.c.bf16 %v3050_v57, %v3049_v56 }
 0xc35   :  { %3437 = vpow2.f32 %v2091_v59  ;;  %v3051_v59 = vld [vmem:[%s3906_s9 + $0x30] sm:$0xff] }
 0xc36   :  { %3439 = vpow2.f32 %v2083_v60  ;;  %v3052_v60 = vld [vmem:[%s3906_s9 + $0x38] sm:$0xff] }
 0xc37   :  { %3441 = vpow2.f32 %v2089_v61  ;;  %v3374_v61 = vpack.c.bf16 %v3052_v60, %v3051_v59 }
 0xc3e   :  { %v3436_v62 = vpop.eup %3435 }
 0xc3f   :  { %v3438_v63 = vpop.eup %3437 }
 0xc40   :  { %v3440_v0 = vpop.eup %3439  ;;  %v2094_v4 = vadd.f32 %v3438_v63, %v3436_v62 }
 0xc41   :  { %v3442_v5 = vpop.eup %3441 }
 0xc42   :  { %3443 = vrcp.f32 %v2094_v4  ;;  %v2093_v6 = vadd.f32 %v3442_v5, %v3440_v0 }
 0xc44   :  { %3445 = vrcp.f32 %v2093_v6 }
 0xc4c   :  { %v3444_v7 = vpop.eup %3443 }
 0xc4d   :  { %v2098_v8 = vmul.f32 %v3444_v7, %v3436_v62  ;;  %v2185_v9 = vmul.f32 %v3444_v7, %v3438_v63  ;;  %v3090_v62 = vld [vmem:[%s3907_s8 + $0x1] ss:$0 sm:$0xff] }
 0xc4e   :  { %v3446_v10 = vpop.eup %3445 }
 0xc4f   :  { %v2097_v11 = vmul.f32 %v3446_v10, %v3440_v0  ;;  %v2184_v12 = vmul.f32 %v3446_v10, %v3442_v5 }
 0xc51   :  { %3308 = vmatprep.mubr.msk.f32.mxu0 %vm376_vm4, %v2097_v11  ;;  %3313 = vmatprep.mubr.msk.f32.mxu1 %vm376_vm4, %v2184_v12 }
 0xc52   :  { %3309 = vmatmul.mubr.msk.f32.vlgmr.msra.gmra.mrb[22].mxu0 %vm376_vm4, %v2098_v8  ;;  %3314 = vmatmul.mubr.msk.f32.vlgmr.msra.gmra.mrb[20].mxu1 %vm376_vm4, %v2185_v9 }
 0xc53   :  { %3322 = vmatpush3.msra.mxu1 %v3669_v47  ;;  %3317 = vmatpush3.msra.mxu0 %v3043_v13 }
 0xc54   :  { %3326 = vmatprep.subr.mxu0 %v3669_v47  ;;  %3331 = vmatprep.subr.mxu1 %v3047_v41 }
 0xd25   :  { %v3310_v14 = vpop.f32.mrb[22].mxu0  ;;  %v3315_v15 = vpop.f32.mrb[20].mxu1 }
 0xd26   :  { %v2181_v16 = vmul.f32 %v3310_v14, %v1803_v37  ;;  %v2268_v17 = vmul.f32 %v3315_v15, %v1896_v36  ;;  %v2171_v18 = vpop.f32.mrb[23].mxu0  ;;  %v2258_v19 = vpop.f32.mrb[21].mxu1 }
 0xd27   :  { %v2180_v20 = vmul.f32 %v2171_v18, %v1801_v35  ;;  %v2267_v22 = vmul.f32 %v2258_v19, %v1894_v3  ;;  %v3468_v18 = vmov 0.0   ;;  %v3093_v19 = vld [vmem:[%s3908_s10 + $0x1] ss:$0 sm:$0xff] }
 0xd28   :  { %v2270_v23 = vadd.f32 %v2268_v17, %v2181_v16  ;;  %64 = vst.msk [vmem:[#allocation2] sm:$0x1] %vm63_vm6, %v3468_v18 }
 0xd29   :  { %v2269_v24 = vadd.f32 %v2267_v22, %v2180_v20 }
 0xd2a   :  { %2275 = vrot.lane.b32.xlu1 %v2270_v23, %s3467_s21 }
 0xd2b   :  { %2273 = vrot.lane.b32.xlu0 %v2269_v24, %s3467_s21 }
 0xd9c   :  { %v2276_v25 = vpop.permute.xlu1 %2275 }
 0xd9d   :  { %v2274_v26 = vpop.permute.xlu0 %2273  ;;  %v2280_v28 = vsel %vm181_vm2, %v1902_v46, %v2276_v25 }
 0xd9e   :  { %v2279_v27 = vsel %vm181_vm2, %v1901_v1, %v2274_v26  ;;  %v3088_v1 = vld [vmem:[%s3904_s5 + $0x1] ss:$0 sm:$0xff] }
 0xd9f   :  { %3318 = vmatprep.mubr.msk.f32.mxu0 %vm89_vm0, %v2279_v27 }
 0xda0   :  { %3319 = vmatmul.mubr.msk.f32.vlgmr.msra.gmra.mrb[24].mxu0 %vm89_vm0, %v2280_v28 }
 0xda1   :  { %3327 = vmatpush3.msra.mxu0 %v3669_v47 }
 0xda2   :  { %3371 = vmatprep.subr.bf16.mxu0 %v3370_v58 }
 0xe73   :  { %v3320_v30 = vpop.f32.mrb[24].mxu0 }
 0xe74   :  { %v2365_v31 = vadd.f32 %v3320_v30, %v3081_v29  ;;  %v2359_v32 = vpop.f32.mrb[25].mxu0 }
 0xe75   :  { %v2360_v33 = vadd.f32 %v3081_v29, %v2359_v32 }
 0xe76   :  { %v3823_v3 = vadd.f32 %v2365_v31, %v3740_v49 }
 0xe77   :  { %v3820_v34 = vadd.f32 %v2360_v33, %v3737_v48 }
 0xe79   :  { %3323 = vmatprep.mubr.msk.f32.mxu1 %vm89_vm0, %v3820_v34 }
 0xe7a   :  { %3324 = vmatmul.mubr.msk.f32.vlgmr.msra.gmra.mrb[22].mxu1 %vm89_vm0, %v3823_v3 }
 0xe7b   :  { %3332 = vmatpush3.msra.mxu1 %v3047_v41 }
 0xe7c   :  { %3347 = vmatprep.subr.mxu1 %v3468_v18 }
 0xf4d   :  { %v3325_v35 = vpop.f32.mrb[22].mxu1 }
 0xf4e   :  { %v2452_v36 = vsub.f32 %v3823_v3, %v3325_v35  ;;  %v2442_v37 = vpop.f32.mrb[23].mxu1 }
 0xf4f   :  { %v2451_v38 = vsub.f32 %v3820_v34, %v2442_v37 }
 0xf50   :  { %v2454_v40 = vmul.f32 %v2452_v36, %v2452_v36 }
 0xf51   :  { %v2453_v39 = vmul.f32 %v2451_v38, %v2451_v38 }
 0xf53   :  { %3328 = vmatprep.mubr.msk.f32.mxu0 %vm89_vm0, %v2453_v39 }
 0xf54   :  { %3329 = vmatmul.mubr.msk.f32.vlgmr.msra.gmra.mrb[26].mxu0 %vm89_vm0, %v2454_v40 }
 0xf55   :  { %3373 = vmatpush3.bf16.msra.mxu0 %v3370_v58 }
 0xf56   :  { %3375 = vmatprep.subr.bf16.mxu0 %v3374_v61 }
 0xf59   :  { %3377 = vmatpush3.bf16.msra.mxu0 %v3374_v61 }
 0xf5a   :  { %3357 = vmatprep.subr.mxu0 %v3468_v18 }
0x1027   :  { %v3330_v42 = vpop.f32.mrb[26].mxu0 }
0x1028   :  { %v2533_v43 = vadd.f32 1e-05, %v3330_v42  ;;  %v2527_v44 = vpop.f32.mrb[27].mxu0 }
0x1029   :  { %v2528_v45 = vadd.f32 1e-05, %v2527_v44 }
0x102a   :  { %3447 = vrsqrt.f32 %v2533_v43  ;;  %v2918_v43 = vld [vmem:[%s3909_s16] sm:$0xff] }
0x102b   :  { %3449 = vrsqrt.f32 %v2528_v45 }
0x1034   :  { %v3448_v46 = vpop.eup %3447 }
0x1035   :  { %v3450_v50 = vpop.eup %3449  ;;  %v2539_v51 = vmul.f32 %v3448_v46, %v2452_v36 }
0x1036   :  { %v2538_v2 = vmul.f32 %v3450_v50, %v2451_v38  ;;  %v2746_v38 = vld [vmem:[#allocation2] sm:$0x1] }
0x1037   :  { %v2547_v52 = vmul.f32 %v3088_v1, %v2539_v51  ;;  %v2916_v51 = vld [vmem:[%s3911_s15] sm:$0x1] }
0x1038   :  { %v2546_v53 = vmul.f32 %v3088_v1, %v2538_v2 }
0x1039   :  { %v2555_v55 = vadd.f32 %v3089_v21, %v2547_v52  ;;  %v2919_v52 = vld [vmem:[%s3912_s17] sm:$0x1] }
0x103a   :  { %v2554_v54 = vadd.f32 %v3089_v21, %v2546_v53 }
0x103c   :  { %3333 = vmatprep.mubr.msk.f32.mxu1 %vm89_vm0, %v2554_v54 }
0x103d   :  { %3334 = vmatmul.mubr.msk.f32.vlgmr.msra.gmra.mrb[24].mxu1 %vm89_vm0, %v2555_v55 }
0x103e   :  { %3348 = vmatpush3.msra.mxu1 %v3669_v47  ;;  %3349 = vmatprep.mubr.msk.f32.mxu1 %vm3469_vm7, %v3468_v18 }
0x103f   :  { %3352 = vmatprep.subr.mxu1 %v3468_v18 }
0x1110   :  { %v3335_v63 = vpop.f32.mrb[24].mxu1 }
0x1111   :  { %v2640_v0 = vadd.f32 %v3335_v63, %v3090_v62  ;;  %v2634_v4 = vpop.f32.mrb[25].mxu1 }
0x1112   :  { %v2635_v5 = vadd.f32 %v3090_v62, %v2634_v4 }
0x1113   :  { %v2644_v6 = vsub.f32 0.0, %v2640_v0 }
0x1114   :  { %v2643_v7 = vsub.f32 0.0, %v2635_v5 }
0x1115   :  { %v2647_v8 = vmul.f32 1.442695, %v2644_v6 }
0x1116   :  { %v2645_v9 = vmul.f32 1.442695, %v2643_v7 }
0x1117   :  { %3451 = vpow2.f32 %v2647_v8 }
0x1118   :  { %3453 = vpow2.f32 %v2645_v9 }
0x1121   :  { %v3452_v10 = vpop.eup %3451 }
0x1122   :  { %v3454_v11 = vpop.eup %3453  ;;  %v2650_v12 = vadd.f32 1.0, %v3452_v10 }
0x1123   :  { %v2649_v13 = vadd.f32 1.0, %v3454_v11 }
0x1124   :  { %3455 = vrcp.f32 %v2650_v12 }
0x1125   :  { %3457 = vrcp.f32 %v2649_v13 }
0x112e   :  { %v3456_v14 = vpop.eup %3455 }
0x112f   :  { %v3458_v15 = vpop.eup %3457  ;;  %v2654_v17 = vmul.f32 %v3456_v14, %v2640_v0 }
0x1130   :  { %v2653_v16 = vmul.f32 %v3458_v15, %v2635_v5 }
0x1132   :  { %3344 = vmatprep.mubr.msk.f32.mxu0 %vm1323_vm5, %v2653_v16 }
0x1133   :  { %3345 = vmatmul.mubr.msk.f32.vlgmr.msra.gmra.mrb[28].mxu0 %vm1323_vm5, %v2654_v17 }
0x1134   :  { %3359 = vmatprep.mubr.msk.f32.mxu0 %vm3469_vm7, %v3468_v18  ;;  %3358 = vmatpush3.msra.mxu0 %v2918_v43 }
0x1206   :  { %v3346_v20 = vpop.f32.mrb[28].mxu0 }
0x1207   :  { %v2739_v22 = vadd.f32 %v3346_v20, %v3093_v19  ;;  %v2733_v23 = vpop.f32.mrb[29].mxu0 }
0x1208   :  { %v2734_v24 = vadd.f32 %v3093_v19, %v2733_v23 }
0x1209   :  { %v2743_v25 = vadd.f32 %v2739_v22, %v3823_v3 }
0x120a   :  { %v2742_v26 = vadd.f32 %v2734_v24, %v3820_v34 }
0x120b   :  { %v2745_v27 = vadd.f32 %v2743_v25, %v3740_v49 }
0x120c   :  { %v2744_v28 = vadd.f32 %v2742_v26, %v3737_v48 }
0x120d   :  { %v2748_v29 = vsel %vm89_vm0, %v2745_v27, 0.0 }
0x120e   :  { %v2747_v30 = vsel %vm89_vm0, %v2744_v28, 0.0 }
0x120f   :  { %v2749_v31 = vadd.f32 %v2748_v29, %v2747_v30 }
0x1211   :  { %v2750_v32 = vrot.slane %v2749_v31, 4 }
0x1213   :  { %v2751_v33 = vadd.f32 %v2750_v32, %v2749_v31 }
0x1215   :  { %v2752_v35 = vrot.slane %v2751_v33, 2 }
0x1217   :  { %v2753_v36 = vadd.f32 %v2752_v35, %v2751_v33 }
0x1219   :  { %v2754_v37 = vrot.slane %v2753_v36, 1 }
0x121b   :  { %v2755_v39 = vadd.f32 %v2754_v37, %v2753_v36 }
0x121d   :  { %v2756_v40 = vadd.f32 %v2755_v39, %v2746_v38 }
0x121f   :  { %2758 = vst.msk [vmem:[#allocation2] sm:$0x1] %vm63_vm6, %v2756_v40 }
0x1226   :  { %v2762_v34 = vld [vmem:[#allocation2] sm:$0x1] }
0x1227   :  { %v2763_v3 = vmul.f32 0.0625, %v2762_v34 }
0x1229   :  { %3350 = vmatmul.mubr.msk.f32.vlgmr.msra.gmra.mrb[26].mxu1 %vm89_vm0, %v2763_v3 }
0x122a   :  { %3353 = vmatpush3.msra.mxu1 %v3669_v47  ;;  %3354 = vmatprep.mubr.msk.f32.mxu1 %vm3469_vm7, %v3468_v18  ;;  %v2914_v47 = vld [vmem:[%s3910_s14] sm:$0x1] }
0x12fc   :  { %v2833_v48 = vpop.f32.mrb[26].mxu1 }
0x12fd   :  { %v2837_v49 = vsub.f32 %v2763_v3, %v2833_v48  ;;  %v3351_v41 = vpop.f32.mrb[27].mxu1 }
0x12ff   :  { %v2838_v42 = vmul.f32 %v2837_v49, %v2837_v49 }
0x1301   :  { %3355 = vmatmul.mubr.msk.f32.vlgmr.msra.gmra.mrb[28].mxu1 %vm89_vm0, %v2838_v42 }
0x13d4   :  { %v2908_v44 = vpop.f32.mrb[28].mxu1 }
0x13d5   :  { %v2909_v45 = vadd.f32 1e-05, %v2908_v44  ;;  %v3356_v46 = vpop.f32.mrb[29].mxu1 }
0x13d7   :  { %3459 = vrsqrt.f32 %v2909_v45 }
0x13e1   :  { %v3460_v1 = vpop.eup %3459 }
0x13e2   :  { %v2913_v50 = vmul.f32 %v3460_v1, %v2837_v49 }
0x13e4   :  { %v2915_v2 = vmul.f32 %v2914_v47, %v2913_v50 }
0x13e6   :  { %v2917_v21 = vadd.f32 %v2916_v51, %v2915_v2 }
0x13e8   :  { %3360 = vmatmul.mubr.msk.f32.vlgmr.msra.gmra.mrb[30].mxu0 %vm89_vm0, %v2917_v21 }
0x14bb   :  { %v2989_v53 = vpop.f32.mrb[30].mxu0 }
0x14bc   :  { %v2990_v54 = vadd.f32 %v2989_v53, %v2919_v52  ;;  %v3361_v55 = vpop.f32.mrb[31].mxu0 }
0x14be   :  { %2994 = vst.msk [vmem:[%s3913_s18] sm:$0x1] %vm2993_vm8, %v2990_v54 }

</bundles_post_ra>
